<compile_context>
chip_gen: v7x
topology: tpu7x:2x2x1
jax: 0.10.0
libtpu: 0.0.40
codegen_flags: <defaults>
</compile_context>

<pallas_src>
import jax
import jax.numpy as jnp
from jax import lax
from jax.experimental import pallas as pl
from jax.experimental.pallas import tpu as pltpu

EPS = 1e-12  # matches torch.nn.functional.normalize default eps


def _round_up(x: int, m: int) -> int:
    return ((x + m - 1) // m) * m


def supcon_keynet_kernel(x_ref, we_ref, be_ref, wh_ref, bh_ref, out_ref, acc_ref):
    # Grid: (batch_tile i, encoder-K tile k).  Shapes (per block):
    #   x_ref:  (TB, TK)          bf16   flattened image tile
    #   we_ref: (TK, DIM_IN)      bf16   encoder weight K-slice
    #   be_ref: (1, DIM_IN)       f32    encoder bias
    #   wh_ref: (DIM_IN, FEAT)    bf16   head weight (VMEM-resident)
    #   bh_ref: (1, FEAT)         f32    head bias
    #   out_ref:(TB, FEAT)        f32
    #   acc_ref:(TB, DIM_IN)      f32    encoder accumulator scratch
    k = pl.program_id(1)

    @pl.when(k == 0)
    def _init():
        # Fold the encoder bias into the accumulator init (saves a full-tile VPU pass).
        acc_ref[...] = jnp.broadcast_to(be_ref[...], acc_ref.shape)

    # K-step of the encoder matmul: bf16 MXU inputs, f32 accumulation.
    acc_ref[...] += jnp.dot(
        x_ref[...], we_ref[...], preferred_element_type=jnp.float32
    )

    @pl.when(k == pl.num_programs(1) - 1)
    def _epilogue():
        # Encoder ReLU (f32).
        enc = jnp.maximum(acc_ref[...], 0.0)

        # F.normalize(enc, dim=1): x * rsqrt(max(sum(x^2), eps^2))  (== x / clamp_min(||x||, eps))
        inv_enc = lax.rsqrt(
            jnp.maximum(jnp.sum(enc * enc, axis=1, keepdims=True), EPS * EPS)
        )
        feat = enc * inv_enc

        # Head linear: bf16 MXU inputs, f32 accumulation, f32 bias add.
        h = (
            jnp.dot(feat.astype(wh_ref.dtype), wh_ref[...],
                    preferred_element_type=jnp.float32)
            + bh_ref[...]
        )

        # F.normalize(h, dim=1) in f32.
        inv_h = lax.rsqrt(
            jnp.maximum(jnp.sum(h * h, axis=1, keepdims=True), EPS * EPS)
        )
        out_ref[...] = (h * inv_h).astype(out_ref.dtype)


def supcon_keynet_forward(x_nchw, params):
    """x_nchw: (B, C, H, W) float32. Returns (B, feat_dim) L2-normalized embeddings."""
    B = x_nchw.shape[0]
    x_flat = x_nchw.reshape(B, -1)            # glue: NCHW -> (B, C*H*W)
    D_flat = x_flat.shape[1]

    we, be, wh, bh = params["we"], params["be"], params["wh"], params["bh"]
    dim_in, feat_dim = wh.shape

    # ---- tile sizes / padded shapes --------------------------------------
    TB = 128 if B >= 128 else _round_up(B, 8)          # rows per batch tile (f32 sublane = 8)
    B_pad = _round_up(B, TB)
    TK = 1024 if D_flat >= 1024 else _round_up(D_flat, 128)  # encoder K tile (lane-aligned)
    D_pad = _round_up(D_flat, TK)
    dim_in_p = _round_up(dim_in, 128)
    feat_p = _round_up(feat_dim, 128)                   # keep output lane-dense (>=128)

    # ---- zero-pad + cast matmul operands to bf16 (biases stay f32) -------
    x_p = jnp.zeros((B_pad, D_pad), jnp.bfloat16).at[:B, :D_flat].set(
        x_flat.astype(jnp.bfloat16))
    we_p = jnp.zeros((D_pad, dim_in_p), jnp.bfloat16).at[:D_flat, :dim_in].set(
        we.astype(jnp.bfloat16))
    be_p = jnp.zeros((1, dim_in_p), jnp.float32).at[:, :dim_in].set(
        be.astype(jnp.float32))
    wh_p = jnp.zeros((dim_in_p, feat_p), jnp.bfloat16).at[:dim_in, :feat_dim].set(
        wh.astype(jnp.bfloat16))
    bh_p = jnp.zeros((1, feat_p), jnp.float32).at[:, :feat_dim].set(
        bh.astype(jnp.float32))

    n_b = B_pad // TB
    n_k = D_pad // TK

    cost = pl.CostEstimate(
        flops=2 * B_pad * (D_pad * dim_in_p + dim_in_p * feat_p),
        transcendentals=2 * B_pad,
        bytes_accessed=(
            x_p.size * 2 + we_p.size * 2 + wh_p.size * 2
            + be_p.size * 4 + bh_p.size * 4 + B_pad * feat_p * 4
        ),
    )

    out_padded = pl.pallas_call(
        supcon_keynet_kernel,
        out_shape=jax.ShapeDtypeStruct((B_pad, feat_p), jnp.float32),
        grid_spec=pltpu.PrefetchScalarGridSpec(
            num_scalar_prefetch=0,
            grid=(n_b, n_k),                              # reduction axis last
            in_specs=[
                pl.BlockSpec((TB, TK), lambda i, k: (i, k)),          # x tile
                pl.BlockSpec((TK, dim_in_p), lambda i, k: (k, 0)),    # encoder W K-slice
                pl.BlockSpec((1, dim_in_p), lambda i, k: (0, 0)),     # encoder bias (resident)
                pl.BlockSpec((dim_in_p, feat_p), lambda i, k: (0, 0)),  # head W (resident)
                pl.BlockSpec((1, feat_p), lambda i, k: (0, 0)),       # head bias (resident)
            ],
            out_specs=pl.BlockSpec((TB, feat_p), lambda i, k: (i, 0)),
            scratch_shapes=[pltpu.VMEM((TB, dim_in_p), jnp.float32)],
        ),
        compiler_params=pltpu.CompilerParams(
            dimension_semantics=("parallel", "arbitrary"),
        ),
        cost_estimate=cost,
    )(x_p, we_p, be_p, wh_p, bh_p)

    return out_padded[:B, :feat_dim]


def init_params(key, d_flat, dim_in=512, feat_dim=128):
    """Deterministic nn.Linear-style init (uniform(-1/sqrt(fan_in), 1/sqrt(fan_in)))."""
    k1, k2, k3, k4 = jax.random.split(key, 4)
    b_enc = 1.0 / jnp.sqrt(jnp.float32(d_flat))
    b_head = 1.0 / jnp.sqrt(jnp.float32(dim_in))
    return {
        # stored pre-transposed so the kernel does x @ W directly
        "we": jax.random.uniform(k1, (d_flat, dim_in), jnp.float32, -b_enc, b_enc),
        "be": jax.random.uniform(k2, (1, dim_in), jnp.float32, -b_enc, b_enc),
        "wh": jax.random.uniform(k3, (dim_in, feat_dim), jnp.float32, -b_head, b_head),
        "bh": jax.random.uniform(k4, (1, feat_dim), jnp.float32, -b_head, b_head),
    }


if __name__ == "__main__":
    key = jax.random.PRNGKey(0)
    kx, kp = jax.random.split(key)

    # Small shapes consistent with the module: batch=2, C=4, H=W=16 (NCHW),
    # head='linear', dim_in=512, feat_dim=128.
    # TODO(synk): 'mlp' head variant (Linear-ReLU-Linear) not wired up; only 'linear'.
    B, C, H, W = 2, 4, 16, 16
    dim_in, feat_dim = 512, 128

    x = jax.random.normal(kx, (B, C, H, W), jnp.float32)
    params = init_params(kp, C * H * W, dim_in, feat_dim)

    out = supcon_keynet_forward(x, params)
    out = jax.block_until_ready(out)

    # sanity: rows are unit-norm, output shape is (B, feat_dim)
    assert out.shape == (B, feat_dim)
    norms = jnp.linalg.norm(out, axis=1)
    assert bool(jnp.all(jnp.abs(norms - 1.0) < 1e-4))

    print("KERNEL_OK")
</pallas_src>

<mosaic_0001>
module attributes {stable_mosaic.version = 11 : i64} {
  func.func @supcon_keynet_kernel(%arg0: i32, %arg1: i32, %arg2: memref<8x1024xbf16, #tpu.memory_space<vmem>>, %arg3: memref<1024x512xbf16, #tpu.memory_space<vmem>>, %arg4: memref<1x512xf32, #tpu.memory_space<vmem>>, %arg5: memref<512x128xbf16, #tpu.memory_space<vmem>>, %arg6: memref<1x128xf32, #tpu.memory_space<vmem>>, %arg7: memref<8x128xf32, #tpu.memory_space<vmem>>, %arg8: memref<8x512xf32, #tpu.memory_space<vmem>>) attributes {dimension_semantics = [#tpu.dimension_semantics<parallel>, #tpu.dimension_semantics<arbitrary>], iteration_bounds = array<i64: 1, 1>, scalar_prefetch = 0 : i64, scratch_operands = 1 : i64, tpu.core_type = #tpu.core_type<tc>, window_params = [{transform_indices = @transform_0, window_bounds = array<i64: 8, 1024>}, {transform_indices = @transform_1, window_bounds = array<i64: 1024, 512>}, {pipeline_mode = #tpu.pipeline_mode<synchronous>, transform_indices = @transform_2, window_bounds = array<i64: 1, 512>}, {pipeline_mode = #tpu.pipeline_mode<synchronous>, transform_indices = @transform_3, window_bounds = array<i64: 512, 128>}, {pipeline_mode = #tpu.pipeline_mode<synchronous>, transform_indices = @transform_4, window_bounds = array<i64: 1, 128>}, {transform_indices = @transform_5, window_bounds = array<i64: 8, 128>}]} {
    %c0_i32 = arith.constant 0 : i32
    %0 = arith.cmpi eq, %arg1, %c0_i32 : i32
    %1 = arith.extui %0 : i1 to i32
    %c0_i32_0 = arith.constant 0 : i32
    %2 = arith.cmpi ne, %1, %c0_i32_0 : i32
    scf.if %2 {
      %c0_10 = arith.constant 0 : index
      %c0_11 = arith.constant 0 : index
      %12 = vector.load %arg4[%c0_10, %c0_11] : memref<1x512xf32, #tpu.memory_space<vmem>>, vector<1x512xf32>
      %13 = vector.shape_cast %12 : vector<1x512xf32> to vector<1x512xf32>
      %14 = vector.broadcast %13 : vector<1x512xf32> to vector<8x512xf32>
      %c0_12 = arith.constant 0 : index
      %c0_13 = arith.constant 0 : index
      %15 = vector.load %arg8[%c0_12, %c0_13] : memref<8x512xf32, #tpu.memory_space<vmem>>, vector<8x512xf32>
      tpu.vector_store %arg8[%c0_12, %c0_13], %14 {strides = array<i32>} : memref<8x512xf32, #tpu.memory_space<vmem>>, vector<8x512xf32>,
    } else {
    }
    %c0 = arith.constant 0 : index
    %c0_1 = arith.constant 0 : index
    %3 = vector.load %arg8[%c0, %c0_1] : memref<8x512xf32, #tpu.memory_space<vmem>>, vector<8x512xf32>
    %c0_2 = arith.constant 0 : index
    %c0_3 = arith.constant 0 : index
    %4 = vector.load %arg2[%c0_2, %c0_3] : memref<8x1024xbf16, #tpu.memory_space<vmem>>, vector<8x1024xbf16>
    %c0_4 = arith.constant 0 : index
    %c0_5 = arith.constant 0 : index
    %5 = vector.load %arg3[%c0_4, %c0_5] : memref<1024x512xbf16, #tpu.memory_space<vmem>>, vector<1024x512xbf16>
    %cst = arith.constant dense<0.000000e+00> : vector<8x512xf32>
    %6 = tpu.matmul %4, %5, %cst {dimension_numbers = #tpu.dot_dimension_numbers<[1], [0], [0], [1], [0, 0, 1, 1], [], []>} : vector<8x1024xbf16>, vector<1024x512xbf16>, vector<8x512xf32> -> vector<8x512xf32>
    %7 = arith.addf %3, %6 : vector<8x512xf32>
    %c0_6 = arith.constant 0 : index
    %c0_7 = arith.constant 0 : index
    %8 = vector.load %arg8[%c0_6, %c0_7] : memref<8x512xf32, #tpu.memory_space<vmem>>, vector<8x512xf32>
    tpu.vector_store %arg8[%c0_6, %c0_7], %7 {strides = array<i32>} : memref<8x512xf32, #tpu.memory_space<vmem>>, vector<8x512xf32>,
    %c0_i32_8 = arith.constant 0 : i32
    %9 = arith.cmpi eq, %arg1, %c0_i32_8 : i32
    %10 = arith.extui %9 : i1 to i32
    %c0_i32_9 = arith.constant 0 : i32
    %11 = arith.cmpi ne, %10, %c0_i32_9 : i32
    scf.if %11 {
      %c0_10 = arith.constant 0 : index
      %c0_11 = arith.constant 0 : index
      %12 = vector.load %arg8[%c0_10, %c0_11] : memref<8x512xf32, #tpu.memory_space<vmem>>, vector<8x512xf32>
      %cst_12 = arith.constant 0.000000e+00 : f32
      %13 = vector.broadcast %cst_12 : f32 to vector<8x512xf32>
      %14 = arith.maximumf %12, %13 : vector<8x512xf32>
      %15 = arith.mulf %14, %14 : vector<8x512xf32>
      %cst_13 = arith.constant dense<0.000000e+00> : vector<8xf32>
      %16 = vector.multi_reduction <add>, %15, %cst_13 [1] : vector<8x512xf32> to vector<8xf32>
      %17 = vector.shape_cast %16 : vector<8xf32> to vector<8x1xf32>
      %cst_14 = arith.constant 1.000000e-24 : f32
      %18 = vector.broadcast %cst_14 : f32 to vector<8x1xf32>
      %19 = arith.maximumf %17, %18 : vector<8x1xf32>
      %20 = math.rsqrt %19 : vector<8x1xf32>
      %21 = vector.broadcast %20 : vector<8x1xf32> to vector<8x512xf32>
      %22 = arith.mulf %14, %21 : vector<8x512xf32>
      %23 = arith.truncf %22 : vector<8x512xf32> to vector<8x512xbf16>
      %c0_15 = arith.constant 0 : index
      %c0_16 = arith.constant 0 : index
      %24 = vector.load %arg5[%c0_15, %c0_16] : memref<512x128xbf16, #tpu.memory_space<vmem>>, vector<512x128xbf16>
      %cst_17 = arith.constant dense<0.000000e+00> : vector<8x128xf32>
      %25 = tpu.matmul %23, %24, %cst_17 {dimension_numbers = #tpu.dot_dimension_numbers<[1], [0], [0], [1], [0, 0, 1, 1], [], []>} : vector<8x512xbf16>, vector<512x128xbf16>, vector<8x128xf32> -> vector<8x128xf32>
      %c0_18 = arith.constant 0 : index
      %c0_19 = arith.constant 0 : index
      %26 = vector.load %arg6[%c0_18, %c0_19] : memref<1x128xf32, #tpu.memory_space<vmem>>, vector<1x128xf32>
      %27 = vector.broadcast %26 : vector<1x128xf32> to vector<8x128xf32>
      %28 = arith.addf %25, %27 : vector<8x128xf32>
      %29 = arith.mulf %28, %28 : vector<8x128xf32>
      %cst_20 = arith.constant dense<0.000000e+00> : vector<8xf32>
      %30 = vector.multi_reduction <add>, %29, %cst_20 [1] : vector<8x128xf32> to vector<8xf32>
      %31 = vector.shape_cast %30 : vector<8xf32> to vector<8x1xf32>
      %cst_21 = arith.constant 1.000000e-24 : f32
      %32 = vector.broadcast %cst_21 : f32 to vector<8x1xf32>
      %33 = arith.maximumf %31, %32 : vector<8x1xf32>
      %34 = math.rsqrt %33 : vector<8x1xf32>
      %35 = vector.broadcast %34 : vector<8x1xf32> to vector<8x128xf32>
      %36 = arith.mulf %28, %35 : vector<8x128xf32>
      %c0_22 = arith.constant 0 : index
      %c0_23 = arith.constant 0 : index
      %37 = vector.load %arg7[%c0_22, %c0_23] : memref<8x128xf32, #tpu.memory_space<vmem>>, vector<8x128xf32>
      tpu.vector_store %arg7[%c0_22, %c0_23], %36 {strides = array<i32>} : memref<8x128xf32, #tpu.memory_space<vmem>>, vector<8x128xf32>,
    } else {
    }
    return
  }
  func.func @transform_0(%arg0: i32, %arg1: i32) -> (i32, i32) {
    %c0_i32 = arith.constant 0 : i32
    return %arg0, %arg1 : i32, i32
  }
  func.func @transform_1(%arg0: i32, %arg1: i32) -> (i32, i32) {
    %c0_i32 = arith.constant 0 : i32
    %c0_i32_0 = arith.constant 0 : i32
    return %arg1, %c0_i32 : i32, i32
  }
  func.func @transform_2(%arg0: i32, %arg1: i32) -> (i32, i32) {
    %c0_i32 = arith.constant 0 : i32
    %c0_i32_0 = arith.constant 0 : i32
    %c0_i32_1 = arith.constant 0 : i32
    return %c0_i32, %c0_i32_0 : i32, i32
  }
  func.func @transform_3(%arg0: i32, %arg1: i32) -> (i32, i32) {
    %c0_i32 = arith.constant 0 : i32
    %c0_i32_0 = arith.constant 0 : i32
    %c0_i32_1 = arith.constant 0 : i32
    return %c0_i32, %c0_i32_0 : i32, i32
  }
  func.func @transform_4(%arg0: i32, %arg1: i32) -> (i32, i32) {
    %c0_i32 = arith.constant 0 : i32
    %c0_i32_0 = arith.constant 0 : i32
    %c0_i32_1 = arith.constant 0 : i32
    return %c0_i32, %c0_i32_0 : i32, i32
  }
  func.func @transform_5(%arg0: i32, %arg1: i32) -> (i32, i32) {
    %c0_i32 = arith.constant 0 : i32
    %c0_i32_0 = arith.constant 0 : i32
    return %arg0, %c0_i32 : i32, i32
  }
}

</mosaic_0001>

<bundles_post_ra>
// kernel: tpu_custom_call.1
= control target key start
LH: loop header
LB: loop body
LE: loop exit
PB: predicated region body
PF: predicated region fallthrough
CT: control target
= control target key end

     0   :  { %10 = vsyncpa [#allocation4], 0  ;;  %s3407_s0 = inlined_call_operand.hbm [shape: bf16[8,1024], index: 0, kind: input, shape index: {}]   ;;  %s3408_s1 = inlined_call_operand.hbm [shape: bf16[1024,512], index: 1, kind: input, shape index: {}]   ;;  %s3409_s2 = inlined_call_operand.vmem [shape: f32[1,512], index: 2, kind: input, shape index: {}]   ;;  %s3410_s3 = inlined_call_operand.hbm [shape: bf16[512,128], index: 3, kind: input, shape index: {}]   ;;  %s3411_s4 = inlined_call_operand.vmem [shape: f32[1,128], index: 4, kind: input, shape index: {}]   ;;  %s3412_s5 = inlined_call_operand.hbm [shape: f32[8,128], index: 5, kind: output, shape index: {}]  }
   0x1   :  { %11 = vsyncpa [#allocation7], 0 }
   0x2   :  { %12 = vsyncpa [#allocation5], 0  ;;  %s3266_s18 = smov [#allocation6]   ;;  %s3172_s22 = scalar_lea.hbm %s3408_s1, 32768 }
   0x3   :  { %s28_s19 = sshll.u32 %s3266_s18, 4  ;;  %p3173_p0 = scmp.ne.s32.totalorder %s3408_s1, %s3172_s22  ;;  %s29_s19 = int_to_ptr.vmem [resolvable:$true] %s28_s19 }
   0x4   :  { %p3176_p1 = scmp.lt.u32.totalorder %s3172_s22, %s3408_s1 }
   0x6   :  { %p3178_p2 = pnand %p3176_p1, %p3173_p0 }
   0x8   :  { %3181 = shalt.err (!%p3178_p2)
}
   0x9   :  { %s3182_s27 = scalar_lea.vmem %s29_s19, 32768  ;;  %p3187_p4 = scmp.lt.s32.totalorder %s29_s19, %s29_s19 }
   0xa   :  { %p3183_p3 = scmp.ne.s32.totalorder %s29_s19, %s3182_s27  ;;  %p3188_p5 = scmp.lt.s32.totalorder %s3182_s27, %s3182_s27 }
   0xc   :  { %p3189_p6 = por %p3188_p5, %p3187_p4 }
   0xe   :  { %p3190_p7 = pnand %p3189_p6, %p3183_p3 }
  0x10   :  { %3193 = shalt.err (!%p3190_p7)
}
  0x11   :  { %s3267_s28 = smov 256   ;;  %s3268_s29 = smov 16  }
  0x12   :  { %34 = dma.hbm_to_vmem [thread:$0]  %s3408_s1, 32768, %s29_s19, [#allocation7], %s3267_s28, %s3267_s28, %s3268_s29  }
  0x13   :  { %s3269_s7 = smov [#allocation3]   ;;  %s3270_s9 = smov [#allocation8]  }
  0x14   :  { %s19_s8 = sshll.u32 %s3269_s7, 4  ;;  %s42_s10 = sshll.u32 %s3270_s9, 4  ;;  %s20_s8 = int_to_ptr.vmem [resolvable:$true] %s19_s8  ;;  %s43_s10 = int_to_ptr.vmem [resolvable:$true] %s42_s10 }
  0x15   :  { %s3194_s13 = scalar_lea.hbm %s3407_s0, 512 }
  0x16   :  { %p3195_p8 = scmp.ne.s32.totalorder %s3407_s0, %s3194_s13  ;;  %p3198_p9 = scmp.lt.u32.totalorder %s3194_s13, %s3407_s0 }
  0x18   :  { %p3200_p10 = pnand %p3198_p9, %p3195_p8 }
  0x1a   :  { %3203 = shalt.err (!%p3200_p10)
}
  0x1b   :  { %s3204_s1 = scalar_lea.vmem %s20_s8, 512  ;;  %p3209_p12 = scmp.lt.s32.totalorder %s20_s8, %s20_s8 }
  0x1c   :  { %p3205_p11 = scmp.ne.s32.totalorder %s20_s8, %s3204_s1  ;;  %p3210_p13 = scmp.lt.s32.totalorder %s3204_s1, %s3204_s1 }
  0x1e   :  { %p3211_p0 = por %p3210_p13, %p3209_p12 }
  0x20   :  { %p3212_p1 = pnand %p3211_p0, %p3205_p11 }
  0x22   :  { %3215 = shalt.err (!%p3212_p1)
}
  0x23   :  { %22 = dma.hbm_to_vmem [thread:$0]  %s3407_s0, 512, %s20_s8, [#allocation4]  }
  0x24   :  { %s3216_s22 = scalar_lea.hbm %s3410_s3, 4096 }
  0x25   :  { %p3217_p2 = scmp.ne.s32.totalorder %s3410_s3, %s3216_s22  ;;  %p3220_p3 = scmp.lt.u32.totalorder %s3216_s22, %s3410_s3 }
  0x27   :  { %p3222_p4 = pnand %p3220_p3, %p3217_p2 }
  0x29   :  { %3225 = shalt.err (!%p3222_p4)
}
  0x2a   :  { %s3226_s27 = scalar_lea.vmem %s43_s10, 4096  ;;  %p3231_p6 = scmp.lt.s32.totalorder %s43_s10, %s43_s10 }
  0x2b   :  { %p3227_p5 = scmp.ne.s32.totalorder %s43_s10, %s3226_s27  ;;  %p3232_p7 = scmp.lt.s32.totalorder %s3226_s27, %s3226_s27 }
  0x2d   :  { %p3233_p8 = por %p3232_p7, %p3231_p6 }
  0x2f   :  { %p3234_p9 = pnand %p3233_p8, %p3227_p5 }
  0x31   :  { %3237 = shalt.err (!%p3234_p9)
}
  0x32   :  { %s3271_s0 = smov 64   ;;  %s3272_s28 = smov 4  }
  0x33   :  { %48 = dma.hbm_to_vmem [thread:$0]  %s3410_s3, 4096, %s43_s10, [#allocation7], %s3271_s0, %s3271_s0, %s3272_s28  }
  0x34   :  { %3260 = dma.done.wait [#allocation4], 512  }
  0x35   :  { %3261 = vsyncadd [#allocation4], 4294966784 }
  0x36   :  { %3262 = dma.done.wait [#allocation7], 36864  }
  0x37   :  { %3263 = vsyncadd [#allocation7], 4294930432  ;;  %v2744_v0 = vld [vmem:[#allocation6 + $0x4] ss:$16 sps:$4 sm:$0xff]   ;;  %v2748_v2 = vld [vmem:[#allocation6] ss:$16 sps:$4 sm:$0xff]  }
  0x38   :  { %v2746_v1 = vld [vmem:[#allocation6 + $0x204] ss:$16 sps:$4 sm:$0xff]   ;;  %1663 = vmatprep.subr.bf16.mxu0 %v2744_v0  ;;  %v2749_v3 = vld [vmem:[#allocation6 + $0x200] ss:$16 sps:$4 sm:$0xff]   ;;  %v96_v48 = vld [vmem:[#allocation3 + $0x8] sm:$0xff]  ;;  %s3273_s8 = smov [#allocation9]  }
  0x39   :  { %1704 = vmatprep.subr.bf16.mxu1 %v2746_v1  ;;  %v2750_v4 = vld [vmem:[#allocation6 + $0x24] ss:$16 sps:$4 sm:$0xff]   ;;  %1664 = vmatpush1.bf16.msra.mxu0 %v2748_v2  ;;  %v2754_v6 = vld [vmem:[#allocation6 + $0x20] ss:$16 sps:$4 sm:$0xff]   ;;  %v3342_v51 = vcombine.high %v96_v48, %v96_v48  ;;  %s2385_s9 = sshll.u32 %s3273_s8, 4  ;;  %s2386_s9 = int_to_ptr.vmem [resolvable:$true] %s2385_s9 }
  0x3a   :  { %1705 = vmatpush1.bf16.msra.mxu1 %v2749_v3  ;;  %v2752_v5 = vld [vmem:[#allocation6 + $0x224] ss:$16 sps:$4 sm:$0xff]   ;;  %1665 = vmatprep.subr.bf16.mxu0 %v2750_v4  ;;  %v2755_v7 = vld [vmem:[#allocation6 + $0x220] ss:$16 sps:$4 sm:$0xff]   ;;  %p3243_p11 = scmp.lt.s32.totalorder %s2386_s9, %s2386_s9 }
  0x3b   :  { %1706 = vmatprep.subr.bf16.mxu1 %v2752_v5  ;;  %v2756_v8 = vld [vmem:[#allocation6 + $0x44] ss:$16 sps:$4 sm:$0xff]   ;;  %v2760_v10 = vld [vmem:[#allocation6 + $0x40] ss:$16 sps:$4 sm:$0xff]   ;;  %1736 = vmatprep.mubr.bf16.mxu1 %v3342_v51 }
  0x3c   :  { %v2758_v9 = vld [vmem:[#allocation6 + $0x244] ss:$16 sps:$4 sm:$0xff]   ;;  %v2761_v11 = vld [vmem:[#allocation6 + $0x240] ss:$16 sps:$4 sm:$0xff]  }
  0x3d   :  { %1666 = vmatpush1.bf16.msra.mxu0 %v2754_v6  ;;  %v2762_v12 = vld [vmem:[#allocation6 + $0x64] ss:$16 sps:$4 sm:$0xff]   ;;  %v2766_v14 = vld [vmem:[#allocation6 + $0x60] ss:$16 sps:$4 sm:$0xff]  }
  0x3e   :  { %1707 = vmatpush1.bf16.msra.mxu1 %v2755_v7  ;;  %1667 = vmatprep.subr.bf16.mxu0 %v2756_v8  ;;  %v2764_v13 = vld [vmem:[#allocation6 + $0x264] ss:$16 sps:$4 sm:$0xff]   ;;  %v2767_v15 = vld [vmem:[#allocation6 + $0x260] ss:$16 sps:$4 sm:$0xff]   ;;  %v3348_v7 = vcombine.low %v96_v48, %v96_v48 }
  0x3f   :  { %1708 = vmatprep.subr.bf16.mxu1 %v2758_v9  ;;  %v2768_v16 = vld [vmem:[#allocation6 + $0x84] ss:$16 sps:$4 sm:$0xff]   ;;  %v2772_v18 = vld [vmem:[#allocation6 + $0x80] ss:$16 sps:$4 sm:$0xff]  }
  0x40   :  { %v2770_v17 = vld [vmem:[#allocation6 + $0x284] ss:$16 sps:$4 sm:$0xff]   ;;  %v2773_v19 = vld [vmem:[#allocation6 + $0x280] ss:$16 sps:$4 sm:$0xff]  }
  0x41   :  { %1668 = vmatpush1.bf16.msra.mxu0 %v2760_v10  ;;  %v2774_v20 = vld [vmem:[#allocation6 + $0xa4] ss:$16 sps:$4 sm:$0xff]   ;;  %v2778_v22 = vld [vmem:[#allocation6 + $0xa0] ss:$16 sps:$4 sm:$0xff]  }
  0x42   :  { %1709 = vmatpush1.bf16.msra.mxu1 %v2761_v11  ;;  %1669 = vmatprep.subr.bf16.mxu0 %v2762_v12  ;;  %v2776_v21 = vld [vmem:[#allocation6 + $0x2a4] ss:$16 sps:$4 sm:$0xff]   ;;  %v2779_v23 = vld [vmem:[#allocation6 + $0x2a0] ss:$16 sps:$4 sm:$0xff]  }
  0x43   :  { %1710 = vmatprep.subr.bf16.mxu1 %v2764_v13  ;;  %v2780_v24 = vld [vmem:[#allocation6 + $0xc4] ss:$16 sps:$4 sm:$0xff]   ;;  %v2784_v26 = vld [vmem:[#allocation6 + $0xc0] ss:$16 sps:$4 sm:$0xff]  }
  0x44   :  { %v2782_v25 = vld [vmem:[#allocation6 + $0x2c4] ss:$16 sps:$4 sm:$0xff]   ;;  %v2785_v27 = vld [vmem:[#allocation6 + $0x2c0] ss:$16 sps:$4 sm:$0xff]  }
  0x45   :  { %1670 = vmatpush1.bf16.msra.mxu0 %v2766_v14  ;;  %v2786_v28 = vld [vmem:[#allocation6 + $0xe4] ss:$16 sps:$4 sm:$0xff]   ;;  %v2790_v30 = vld [vmem:[#allocation6 + $0xe0] ss:$16 sps:$4 sm:$0xff]  }
  0x46   :  { %1711 = vmatpush1.bf16.msra.mxu1 %v2767_v15  ;;  %1671 = vmatprep.subr.bf16.mxu0 %v2768_v16  ;;  %v2788_v29 = vld [vmem:[#allocation6 + $0x2e4] ss:$16 sps:$4 sm:$0xff]   ;;  %v2791_v31 = vld [vmem:[#allocation6 + $0x2e0] ss:$16 sps:$4 sm:$0xff]  }
  0x47   :  { %1712 = vmatprep.subr.bf16.mxu1 %v2770_v17  ;;  %v2792_v32 = vld [vmem:[#allocation6 + $0x104] ss:$16 sps:$4 sm:$0xff]   ;;  %v2796_v34 = vld [vmem:[#allocation6 + $0x100] ss:$16 sps:$4 sm:$0xff]  }
  0x48   :  { %v2794_v33 = vld [vmem:[#allocation6 + $0x304] ss:$16 sps:$4 sm:$0xff]   ;;  %v2797_v35 = vld [vmem:[#allocation6 + $0x300] ss:$16 sps:$4 sm:$0xff]  }
  0x49   :  { %1672 = vmatpush1.bf16.msra.mxu0 %v2772_v18  ;;  %v2798_v36 = vld [vmem:[#allocation6 + $0x124] ss:$16 sps:$4 sm:$0xff]   ;;  %v2802_v38 = vld [vmem:[#allocation6 + $0x120] ss:$16 sps:$4 sm:$0xff]  }
  0x4a   :  { %1713 = vmatpush1.bf16.msra.mxu1 %v2773_v19  ;;  %1673 = vmatprep.subr.bf16.mxu0 %v2774_v20  ;;  %v2800_v37 = vld [vmem:[#allocation6 + $0x324] ss:$16 sps:$4 sm:$0xff]   ;;  %v2803_v39 = vld [vmem:[#allocation6 + $0x320] ss:$16 sps:$4 sm:$0xff]  }
  0x4b   :  { %1714 = vmatprep.subr.bf16.mxu1 %v2776_v21  ;;  %v2804_v40 = vld [vmem:[#allocation6 + $0x144] ss:$16 sps:$4 sm:$0xff]   ;;  %v2808_v42 = vld [vmem:[#allocation6 + $0x140] ss:$16 sps:$4 sm:$0xff]  }
  0x4c   :  { %v2806_v41 = vld [vmem:[#allocation6 + $0x344] ss:$16 sps:$4 sm:$0xff]   ;;  %v2809_v43 = vld [vmem:[#allocation6 + $0x340] ss:$16 sps:$4 sm:$0xff]  }
  0x4d   :  { %1674 = vmatpush1.bf16.msra.mxu0 %v2778_v22  ;;  %v2810_v44 = vld [vmem:[#allocation6 + $0x164] ss:$16 sps:$4 sm:$0xff]   ;;  %v2814_v49 = vld [vmem:[#allocation6 + $0x160] ss:$16 sps:$4 sm:$0xff]  }
  0x4e   :  { %1715 = vmatpush1.bf16.msra.mxu1 %v2779_v23  ;;  %1675 = vmatprep.subr.bf16.mxu0 %v2780_v24  ;;  %v2812_v45 = vld [vmem:[#allocation6 + $0x364] ss:$16 sps:$4 sm:$0xff]   ;;  %v2815_v50 = vld [vmem:[#allocation6 + $0x360] ss:$16 sps:$4 sm:$0xff]  }
  0x4f   :  { %1716 = vmatprep.subr.bf16.mxu1 %v2782_v25  ;;  %v95_v46 = vld [vmem:[#allocation3] sm:$0xff] }
  0x50   :  { %v3340_v47 = vcombine.high %v95_v46, %v95_v46  ;;  %v2816_v52 = vld [vmem:[#allocation6 + $0x184] ss:$16 sps:$4 sm:$0xff]   ;;  %v2820_v54 = vld [vmem:[#allocation6 + $0x180] ss:$16 sps:$4 sm:$0xff]   ;;  %v3346_v6 = vcombine.low %v95_v46, %v95_v46 }
  0x51   :  { %1676 = vmatpush1.bf16.msra.mxu0 %v2784_v26  ;;  %v2818_v53 = vld [vmem:[#allocation6 + $0x384] ss:$16 sps:$4 sm:$0xff]   ;;  %v2821_v55 = vld [vmem:[#allocation6 + $0x380] ss:$16 sps:$4 sm:$0xff]  }
  0x52   :  { %1717 = vmatpush1.bf16.msra.mxu1 %v2785_v27  ;;  %1677 = vmatprep.subr.bf16.mxu0 %v2786_v28  ;;  %v2822_v56 = vld [vmem:[#allocation6 + $0x1a4] ss:$16 sps:$4 sm:$0xff]   ;;  %v2826_v58 = vld [vmem:[#allocation6 + $0x1a0] ss:$16 sps:$4 sm:$0xff]  }
  0x53   :  { %1718 = vmatprep.subr.bf16.mxu1 %v2788_v29  ;;  %1695 = vmatprep.mubr.bf16.mxu0 %v3340_v47  ;;  %v2824_v57 = vld [vmem:[#allocation6 + $0x3a4] ss:$16 sps:$4 sm:$0xff]   ;;  %v2827_v59 = vld [vmem:[#allocation6 + $0x3a0] ss:$16 sps:$4 sm:$0xff]  }
  0x54   :  { %v2828_v60 = vld [vmem:[#allocation6 + $0x1c4] ss:$16 sps:$4 sm:$0xff]   ;;  %v2832_v62 = vld [vmem:[#allocation6 + $0x1c0] ss:$16 sps:$4 sm:$0xff]  }
  0x55   :  { %1678 = vmatpush1.bf16.msra.mxu0 %v2790_v30  ;;  %v2830_v61 = vld [vmem:[#allocation6 + $0x3c4] ss:$16 sps:$4 sm:$0xff]   ;;  %v2833_v63 = vld [vmem:[#allocation6 + $0x3c0] ss:$16 sps:$4 sm:$0xff]  }
  0x56   :  { %1719 = vmatpush1.bf16.msra.mxu1 %v2791_v31  ;;  %1679 = vmatprep.subr.bf16.mxu0 %v2792_v32  ;;  %v2834_v0 = vld [vmem:[#allocation6 + $0x1e4] ss:$16 sps:$4 sm:$0xff]   ;;  %v2838_v2 = vld [vmem:[#allocation6 + $0x1e0] ss:$16 sps:$4 sm:$0xff]  }
  0x57   :  { %1720 = vmatprep.subr.bf16.mxu1 %v2794_v33  ;;  %v2836_v1 = vld [vmem:[#allocation6 + $0x3e4] ss:$16 sps:$4 sm:$0xff]   ;;  %v2839_v3 = vld [vmem:[#allocation6 + $0x3e0] ss:$16 sps:$4 sm:$0xff]   ;;  %v3354_v33 = vld [vmem:[#allocation3 + $0x18] sm:$0xff] }
  0x58   :  { %v2846_v4 = vld [vmem:[#allocation6 + $0x404] ss:$16 sps:$4 sm:$0xff]   ;;  %v2844_v8 = vld [vmem:[#allocation6 + $0x400] ss:$16 sps:$4 sm:$0xff]  }
  0x59   :  { %1680 = vmatpush1.bf16.msra.mxu0 %v2796_v34  ;;  %v2849_v5 = vld [vmem:[#allocation6 + $0x604] ss:$16 sps:$4 sm:$0xff]   ;;  %v2847_v9 = vld [vmem:[#allocation6 + $0x600] ss:$16 sps:$4 sm:$0xff]  }
  0x5a   :  { %1721 = vmatpush1.bf16.msra.mxu1 %v2797_v35  ;;  %1681 = vmatprep.subr.bf16.mxu0 %v2798_v36  ;;  %v2852_v10 = vld [vmem:[#allocation6 + $0x424] ss:$16 sps:$4 sm:$0xff]   ;;  %v2850_v12 = vld [vmem:[#allocation6 + $0x420] ss:$16 sps:$4 sm:$0xff]  }
  0x5b   :  { %1722 = vmatprep.subr.bf16.mxu1 %v2800_v37  ;;  %v2855_v11 = vld [vmem:[#allocation6 + $0x624] ss:$16 sps:$4 sm:$0xff]   ;;  %v2853_v13 = vld [vmem:[#allocation6 + $0x620] ss:$16 sps:$4 sm:$0xff]   ;;  %v3362_v37 = vcombine.high %v3354_v33, %v3354_v33 }
  0x5c   :  { %v2858_v14 = vld [vmem:[#allocation6 + $0x444] ss:$16 sps:$4 sm:$0xff]   ;;  %v2856_v16 = vld [vmem:[#allocation6 + $0x440] ss:$16 sps:$4 sm:$0xff]  }
  0x5d   :  { %1682 = vmatpush1.bf16.msra.mxu0 %v2802_v38  ;;  %v2861_v15 = vld [vmem:[#allocation6 + $0x644] ss:$16 sps:$4 sm:$0xff]   ;;  %v2859_v17 = vld [vmem:[#allocation6 + $0x640] ss:$16 sps:$4 sm:$0xff]  }
  0x5e   :  { %1723 = vmatpush1.bf16.msra.mxu1 %v2803_v39  ;;  %1683 = vmatprep.subr.bf16.mxu0 %v2804_v40  ;;  %v2864_v18 = vld [vmem:[#allocation6 + $0x464] ss:$16 sps:$4 sm:$0xff]   ;;  %v2862_v20 = vld [vmem:[#allocation6 + $0x460] ss:$16 sps:$4 sm:$0xff]  }
  0x5f   :  { %1724 = vmatprep.subr.bf16.mxu1 %v2806_v41  ;;  %v2867_v19 = vld [vmem:[#allocation6 + $0x664] ss:$16 sps:$4 sm:$0xff]   ;;  %v2865_v21 = vld [vmem:[#allocation6 + $0x660] ss:$16 sps:$4 sm:$0xff]  }
  0x60   :  { %v2870_v22 = vld [vmem:[#allocation6 + $0x484] ss:$16 sps:$4 sm:$0xff]   ;;  %v2868_v24 = vld [vmem:[#allocation6 + $0x480] ss:$16 sps:$4 sm:$0xff]  }
  0x61   :  { %1684 = vmatpush1.bf16.msra.mxu0 %v2808_v42  ;;  %v2873_v23 = vld [vmem:[#allocation6 + $0x684] ss:$16 sps:$4 sm:$0xff]   ;;  %v2871_v25 = vld [vmem:[#allocation6 + $0x680] ss:$16 sps:$4 sm:$0xff]  }
  0x62   :  { %1725 = vmatpush1.bf16.msra.mxu1 %v2809_v43  ;;  %1685 = vmatprep.subr.bf16.mxu0 %v2810_v44  ;;  %v2876_v26 = vld [vmem:[#allocation6 + $0x4a4] ss:$16 sps:$4 sm:$0xff]   ;;  %v2874_v28 = vld [vmem:[#allocation6 + $0x4a0] ss:$16 sps:$4 sm:$0xff]  }
  0x63   :  { %1726 = vmatprep.subr.bf16.mxu1 %v2812_v45  ;;  %v2879_v27 = vld [vmem:[#allocation6 + $0x6a4] ss:$16 sps:$4 sm:$0xff]   ;;  %v2877_v29 = vld [vmem:[#allocation6 + $0x6a0] ss:$16 sps:$4 sm:$0xff]  }
  0x64   :  { %v2882_v30 = vld [vmem:[#allocation6 + $0x4c4] ss:$16 sps:$4 sm:$0xff]   ;;  %v2880_v34 = vld [vmem:[#allocation6 + $0x4c0] ss:$16 sps:$4 sm:$0xff]  }
  0x65   :  { %1686 = vmatpush1.bf16.msra.mxu0 %v2814_v49  ;;  %v2885_v31 = vld [vmem:[#allocation6 + $0x6c4] ss:$16 sps:$4 sm:$0xff]   ;;  %v2883_v35 = vld [vmem:[#allocation6 + $0x6c0] ss:$16 sps:$4 sm:$0xff]  }
  0x66   :  { %1727 = vmatpush1.bf16.msra.mxu1 %v2815_v50  ;;  %1687 = vmatprep.subr.bf16.mxu0 %v2816_v52  ;;  %v3352_v32 = vld [vmem:[#allocation3 + $0x10] sm:$0xff] }
  0x67   :  { %1728 = vmatprep.subr.bf16.mxu1 %v2818_v53  ;;  %v3358_v36 = vcombine.high %v3352_v32, %v3352_v32  ;;  %v2888_v38 = vld [vmem:[#allocation6 + $0x4e4] ss:$16 sps:$4 sm:$0xff]   ;;  %v2886_v40 = vld [vmem:[#allocation6 + $0x4e0] ss:$16 sps:$4 sm:$0xff]  }
  0x68   :  { %v2891_v39 = vld [vmem:[#allocation6 + $0x6e4] ss:$16 sps:$4 sm:$0xff]   ;;  %v2889_v41 = vld [vmem:[#allocation6 + $0x6e0] ss:$16 sps:$4 sm:$0xff]  }
  0x69   :  { %1688 = vmatpush1.bf16.msra.mxu0 %v2820_v54  ;;  %v2894_v42 = vld [vmem:[#allocation6 + $0x504] ss:$16 sps:$4 sm:$0xff]   ;;  %v2892_v44 = vld [vmem:[#allocation6 + $0x500] ss:$16 sps:$4 sm:$0xff]  }
  0x6a   :  { %1729 = vmatpush1.bf16.msra.mxu1 %v2821_v55  ;;  %1689 = vmatprep.subr.bf16.mxu0 %v2822_v56  ;;  %v2897_v43 = vld [vmem:[#allocation6 + $0x704] ss:$16 sps:$4 sm:$0xff]   ;;  %v2895_v45 = vld [vmem:[#allocation6 + $0x700] ss:$16 sps:$4 sm:$0xff]  }
  0x6b   :  { %1730 = vmatprep.subr.bf16.mxu1 %v2824_v57  ;;  %v2900_v46 = vld [vmem:[#allocation6 + $0x524] ss:$16 sps:$4 sm:$0xff]   ;;  %v2898_v49 = vld [vmem:[#allocation6 + $0x520] ss:$16 sps:$4 sm:$0xff]  }
  0x6c   :  { %v2903_v48 = vld [vmem:[#allocation6 + $0x724] ss:$16 sps:$4 sm:$0xff]   ;;  %v2901_v50 = vld [vmem:[#allocation6 + $0x720] ss:$16 sps:$4 sm:$0xff]  }
  0x6d   :  { %1690 = vmatpush1.bf16.msra.mxu0 %v2826_v58  ;;  %v2906_v52 = vld [vmem:[#allocation6 + $0x544] ss:$16 sps:$4 sm:$0xff]   ;;  %v2904_v54 = vld [vmem:[#allocation6 + $0x540] ss:$16 sps:$4 sm:$0xff]  }
  0x6e   :  { %1731 = vmatpush1.bf16.msra.mxu1 %v2827_v59  ;;  %1691 = vmatprep.subr.bf16.mxu0 %v2828_v60  ;;  %v2909_v53 = vld [vmem:[#allocation6 + $0x744] ss:$16 sps:$4 sm:$0xff]   ;;  %v2907_v55 = vld [vmem:[#allocation6 + $0x740] ss:$16 sps:$4 sm:$0xff]  }
  0x6f   :  { %1732 = vmatprep.subr.bf16.mxu1 %v2830_v61  ;;  %v2912_v56 = vld [vmem:[#allocation6 + $0x564] ss:$16 sps:$4 sm:$0xff]   ;;  %v2910_v58 = vld [vmem:[#allocation6 + $0x560] ss:$16 sps:$4 sm:$0xff]  }
  0x70   :  { %v2915_v57 = vld [vmem:[#allocation6 + $0x764] ss:$16 sps:$4 sm:$0xff]   ;;  %v2913_v59 = vld [vmem:[#allocation6 + $0x760] ss:$16 sps:$4 sm:$0xff]  }
  0x71   :  { %1692 = vmatpush1.bf16.msra.mxu0 %v2832_v62  ;;  %v2918_v60 = vld [vmem:[#allocation6 + $0x584] ss:$16 sps:$4 sm:$0xff]   ;;  %v2916_v62 = vld [vmem:[#allocation6 + $0x580] ss:$16 sps:$4 sm:$0xff]  }
  0x72   :  { %1733 = vmatpush1.bf16.msra.mxu1 %v2833_v63  ;;  %1693 = vmatprep.subr.bf16.mxu0 %v2834_v0  ;;  %v2921_v61 = vld [vmem:[#allocation6 + $0x784] ss:$16 sps:$4 sm:$0xff]   ;;  %v2919_v63 = vld [vmem:[#allocation6 + $0x780] ss:$16 sps:$4 sm:$0xff]  }
  0x73   :  { %1734 = vmatprep.subr.bf16.mxu1 %v2836_v1  ;;  %v2924_v0 = vld [vmem:[#allocation6 + $0x5a4] ss:$16 sps:$4 sm:$0xff]  }
  0x74   :  { %v2927_v1 = vld [vmem:[#allocation6 + $0x7a4] ss:$16 sps:$4 sm:$0xff]  }
  0x75   :  { %1694 = vmatpush1.bf16.msra.mxu0 %v2838_v2  ;;  %v2922_v2 = vld [vmem:[#allocation6 + $0x5a0] ss:$16 sps:$4 sm:$0xff]  }
  0x76   :  { %1735 = vmatpush1.bf16.msra.mxu1 %v2839_v3  ;;  %1745 = vmatprep.subr.bf16.mxu0 %v2846_v4  ;;  %v2925_v3 = vld [vmem:[#allocation6 + $0x7a0] ss:$16 sps:$4 sm:$0xff]   ;;  %v2930_v4 = vld [vmem:[#allocation6 + $0x5c4] ss:$16 sps:$4 sm:$0xff]  }
  0x77   :  { %1786 = vmatprep.subr.bf16.mxu1 %v2849_v5  ;;  %v2933_v5 = vld [vmem:[#allocation6 + $0x7c4] ss:$16 sps:$4 sm:$0xff]  }
  0x78   :  { %1696 = vmatmul.mubr.bf16.vlgmr.msra.gmra.mrb[0].mxu0 %v3346_v6 }
  0x79   :  { %1737 = vmatmul.mubr.bf16.vlgmr.msra.gmra.mrb[0].mxu1 %v3348_v7  ;;  %1746 = vmatpush1.bf16.msra.mxu0 %v2844_v8  ;;  %v2928_v8 = vld [vmem:[#allocation6 + $0x5c0] ss:$16 sps:$4 sm:$0xff]  }
  0x7a   :  { %1787 = vmatpush1.bf16.msra.mxu1 %v2847_v9  ;;  %1747 = vmatprep.subr.bf16.mxu0 %v2852_v10  ;;  %v2931_v9 = vld [vmem:[#allocation6 + $0x7c0] ss:$16 sps:$4 sm:$0xff]   ;;  %v2936_v10 = vld [vmem:[#allocation6 + $0x5e4] ss:$16 sps:$4 sm:$0xff]  }
  0x7b   :  { %1788 = vmatprep.subr.bf16.mxu1 %v2855_v11  ;;  %1777 = vmatprep.mubr.bf16.mxu0 %v3358_v36  ;;  %v2939_v11 = vld [vmem:[#allocation6 + $0x7e4] ss:$16 sps:$4 sm:$0xff]  }
  0x7c   :  { %1818 = vmatprep.mubr.bf16.mxu1 %v3362_v37 }
  0x7d   :  { %1748 = vmatpush1.bf16.msra.mxu0 %v2850_v12  ;;  %v2934_v12 = vld [vmem:[#allocation6 + $0x5e0] ss:$16 sps:$4 sm:$0xff]  }
  0x7e   :  { %1789 = vmatpush1.bf16.msra.mxu1 %v2853_v13  ;;  %1749 = vmatprep.subr.bf16.mxu0 %v2858_v14  ;;  %v2937_v13 = vld [vmem:[#allocation6 + $0x7e0] ss:$16 sps:$4 sm:$0xff]   ;;  %v2946_v14 = vld [vmem:[#allocation6 + $0xc] ss:$16 sps:$4 sm:$0xff]  }
  0x7f   :  { %1790 = vmatprep.subr.bf16.mxu1 %v2861_v15  ;;  %v2949_v15 = vld [vmem:[#allocation6 + $0x20c] ss:$16 sps:$4 sm:$0xff]  }
  0x81   :  { %1750 = vmatpush1.bf16.msra.mxu0 %v2856_v16  ;;  %v3368_v16 = vcombine.low %v3352_v32, %v3352_v32  ;;  %v2970_v32 = vld [vmem:[#allocation6 + $0x8c] ss:$16 sps:$4 sm:$0xff]  }
  0x82   :  { %1791 = vmatpush1.bf16.msra.mxu1 %v2859_v17  ;;  %1751 = vmatprep.subr.bf16.mxu0 %v2864_v18  ;;  %v3372_v17 = vcombine.low %v3354_v33, %v3354_v33  ;;  %v2944_v18 = vld [vmem:[#allocation6 + $0x8] ss:$16 sps:$4 sm:$0xff]   ;;  %v2973_v33 = vld [vmem:[#allocation6 + $0x28c] ss:$16 sps:$4 sm:$0xff]  }
  0x83   :  { %1792 = vmatprep.subr.bf16.mxu1 %v2867_v19  ;;  %v2947_v19 = vld [vmem:[#allocation6 + $0x208] ss:$16 sps:$4 sm:$0xff]  }
  0x85   :  { %1752 = vmatpush1.bf16.msra.mxu0 %v2862_v20  ;;  %v2952_v20 = vld [vmem:[#allocation6 + $0x2c] ss:$16 sps:$4 sm:$0xff]  }
  0x86   :  { %1793 = vmatpush1.bf16.msra.mxu1 %v2865_v21  ;;  %1753 = vmatprep.subr.bf16.mxu0 %v2870_v22  ;;  %v2955_v21 = vld [vmem:[#allocation6 + $0x22c] ss:$16 sps:$4 sm:$0xff]   ;;  %v2950_v22 = vld [vmem:[#allocation6 + $0x28] ss:$16 sps:$4 sm:$0xff]  }
  0x87   :  { %1794 = vmatprep.subr.bf16.mxu1 %v2873_v23  ;;  %v2953_v23 = vld [vmem:[#allocation6 + $0x228] ss:$16 sps:$4 sm:$0xff]  }
  0x89   :  { %1754 = vmatpush1.bf16.msra.mxu0 %v2868_v24  ;;  %v2958_v24 = vld [vmem:[#allocation6 + $0x4c] ss:$16 sps:$4 sm:$0xff]  }
  0x8a   :  { %1795 = vmatpush1.bf16.msra.mxu1 %v2871_v25  ;;  %1755 = vmatprep.subr.bf16.mxu0 %v2876_v26  ;;  %v2961_v25 = vld [vmem:[#allocation6 + $0x24c] ss:$16 sps:$4 sm:$0xff]   ;;  %v2956_v26 = vld [vmem:[#allocation6 + $0x48] ss:$16 sps:$4 sm:$0xff]  }
  0x8b   :  { %1796 = vmatprep.subr.bf16.mxu1 %v2879_v27  ;;  %v2959_v27 = vld [vmem:[#allocation6 + $0x248] ss:$16 sps:$4 sm:$0xff]  }
  0x8d   :  { %1756 = vmatpush1.bf16.msra.mxu0 %v2874_v28  ;;  %v2964_v28 = vld [vmem:[#allocation6 + $0x6c] ss:$16 sps:$4 sm:$0xff]  }
  0x8e   :  { %1797 = vmatpush1.bf16.msra.mxu1 %v2877_v29  ;;  %1757 = vmatprep.subr.bf16.mxu0 %v2882_v30  ;;  %v2967_v29 = vld [vmem:[#allocation6 + $0x26c] ss:$16 sps:$4 sm:$0xff]   ;;  %v2962_v30 = vld [vmem:[#allocation6 + $0x68] ss:$16 sps:$4 sm:$0xff]  }
  0x8f   :  { %1798 = vmatprep.subr.bf16.mxu1 %v2885_v31  ;;  %v2965_v31 = vld [vmem:[#allocation6 + $0x268] ss:$16 sps:$4 sm:$0xff]  }
  0x91   :  { %1758 = vmatpush1.bf16.msra.mxu0 %v2880_v34  ;;  %v2968_v34 = vld [vmem:[#allocation6 + $0x88] ss:$16 sps:$4 sm:$0xff]  }
  0x92   :  { %1799 = vmatpush1.bf16.msra.mxu1 %v2883_v35  ;;  %1759 = vmatprep.subr.bf16.mxu0 %v2888_v38  ;;  %v2979_v35 = vld [vmem:[#allocation6 + $0x2ac] ss:$16 sps:$4 sm:$0xff]   ;;  %v2974_v38 = vld [vmem:[#allocation6 + $0xa8] ss:$16 sps:$4 sm:$0xff]  }
  0x93   :  { %1800 = vmatprep.subr.bf16.mxu1 %v2891_v39  ;;  %v2977_v39 = vld [vmem:[#allocation6 + $0x2a8] ss:$16 sps:$4 sm:$0xff]  }
  0x95   :  { %1760 = vmatpush1.bf16.msra.mxu0 %v2886_v40  ;;  %v2982_v40 = vld [vmem:[#allocation6 + $0xcc] ss:$16 sps:$4 sm:$0xff]  }
  0x96   :  { %1801 = vmatpush1.bf16.msra.mxu1 %v2889_v41  ;;  %1761 = vmatprep.subr.bf16.mxu0 %v2894_v42  ;;  %v2985_v41 = vld [vmem:[#allocation6 + $0x2cc] ss:$16 sps:$4 sm:$0xff]   ;;  %v2980_v42 = vld [vmem:[#allocation6 + $0xc8] ss:$16 sps:$4 sm:$0xff]  }
  0x97   :  { %1802 = vmatprep.subr.bf16.mxu1 %v2897_v43  ;;  %v2983_v43 = vld [vmem:[#allocation6 + $0x2c8] ss:$16 sps:$4 sm:$0xff]  }
  0x99   :  { %1762 = vmatpush1.bf16.msra.mxu0 %v2892_v44  ;;  %v2988_v44 = vld [vmem:[#allocation6 + $0xec] ss:$16 sps:$4 sm:$0xff]  }
  0x9a   :  { %1803 = vmatpush1.bf16.msra.mxu1 %v2895_v45  ;;  %1763 = vmatprep.subr.bf16.mxu0 %v2900_v46  ;;  %v2991_v45 = vld [vmem:[#allocation6 + $0x2ec] ss:$16 sps:$4 sm:$0xff]   ;;  %v2986_v46 = vld [vmem:[#allocation6 + $0xe8] ss:$16 sps:$4 sm:$0xff]  }
  0x9b   :  { %1804 = vmatprep.subr.bf16.mxu1 %v2903_v48  ;;  %v2989_v48 = vld [vmem:[#allocation6 + $0x2e8] ss:$16 sps:$4 sm:$0xff]  }
  0x9d   :  { %1764 = vmatpush1.bf16.msra.mxu0 %v2898_v49  ;;  %v2994_v49 = vld [vmem:[#allocation6 + $0x10c] ss:$16 sps:$4 sm:$0xff]  }
  0x9e   :  { %1805 = vmatpush1.bf16.msra.mxu1 %v2901_v50  ;;  %1765 = vmatprep.subr.bf16.mxu0 %v2906_v52  ;;  %v2997_v50 = vld [vmem:[#allocation6 + $0x30c] ss:$16 sps:$4 sm:$0xff]   ;;  %v2992_v52 = vld [vmem:[#allocation6 + $0x108] ss:$16 sps:$4 sm:$0xff]  }
  0x9f   :  { %1806 = vmatprep.subr.bf16.mxu1 %v2909_v53  ;;  %v2995_v53 = vld [vmem:[#allocation6 + $0x308] ss:$16 sps:$4 sm:$0xff]  }
  0xa1   :  { %1766 = vmatpush1.bf16.msra.mxu0 %v2904_v54  ;;  %v3000_v54 = vld [vmem:[#allocation6 + $0x12c] ss:$16 sps:$4 sm:$0xff]  }
  0xa2   :  { %1807 = vmatpush1.bf16.msra.mxu1 %v2907_v55  ;;  %1767 = vmatprep.subr.bf16.mxu0 %v2912_v56  ;;  %v3003_v55 = vld [vmem:[#allocation6 + $0x32c] ss:$16 sps:$4 sm:$0xff]   ;;  %v2998_v56 = vld [vmem:[#allocation6 + $0x128] ss:$16 sps:$4 sm:$0xff]  }
  0xa3   :  { %1808 = vmatprep.subr.bf16.mxu1 %v2915_v57  ;;  %v3001_v57 = vld [vmem:[#allocation6 + $0x328] ss:$16 sps:$4 sm:$0xff]  }
  0xa5   :  { %1768 = vmatpush1.bf16.msra.mxu0 %v2910_v58  ;;  %v3006_v58 = vld [vmem:[#allocation6 + $0x14c] ss:$16 sps:$4 sm:$0xff]  }
  0xa6   :  { %1809 = vmatpush1.bf16.msra.mxu1 %v2913_v59  ;;  %1769 = vmatprep.subr.bf16.mxu0 %v2918_v60  ;;  %v3009_v59 = vld [vmem:[#allocation6 + $0x34c] ss:$16 sps:$4 sm:$0xff]   ;;  %v3004_v60 = vld [vmem:[#allocation6 + $0x148] ss:$16 sps:$4 sm:$0xff]  }
  0xa7   :  { %1810 = vmatprep.subr.bf16.mxu1 %v2921_v61  ;;  %v3007_v61 = vld [vmem:[#allocation6 + $0x348] ss:$16 sps:$4 sm:$0xff]  }
  0xa9   :  { %1770 = vmatpush1.bf16.msra.mxu0 %v2916_v62  ;;  %v3012_v62 = vld [vmem:[#allocation6 + $0x16c] ss:$16 sps:$4 sm:$0xff]  }
  0xaa   :  { %1811 = vmatpush1.bf16.msra.mxu1 %v2919_v63  ;;  %1771 = vmatprep.subr.bf16.mxu0 %v2924_v0  ;;  %v3015_v63 = vld [vmem:[#allocation6 + $0x36c] ss:$16 sps:$4 sm:$0xff]   ;;  %v3010_v0 = vld [vmem:[#allocation6 + $0x168] ss:$16 sps:$4 sm:$0xff]  }
  0xab   :  { %1812 = vmatprep.subr.bf16.mxu1 %v2927_v1  ;;  %v3013_v1 = vld [vmem:[#allocation6 + $0x368] ss:$16 sps:$4 sm:$0xff]  }
  0xad   :  { %1772 = vmatpush1.bf16.msra.mxu0 %v2922_v2  ;;  %v3018_v2 = vld [vmem:[#allocation6 + $0x18c] ss:$16 sps:$4 sm:$0xff]  }
  0xae   :  { %1813 = vmatpush1.bf16.msra.mxu1 %v2925_v3  ;;  %1773 = vmatprep.subr.bf16.mxu0 %v2930_v4  ;;  %v3021_v3 = vld [vmem:[#allocation6 + $0x38c] ss:$16 sps:$4 sm:$0xff]   ;;  %v3016_v4 = vld [vmem:[#allocation6 + $0x188] ss:$16 sps:$4 sm:$0xff]  }
  0xaf   :  { %1814 = vmatprep.subr.bf16.mxu1 %v2933_v5  ;;  %v3019_v5 = vld [vmem:[#allocation6 + $0x388] ss:$16 sps:$4 sm:$0xff]  }
  0xb1   :  { %1774 = vmatpush1.bf16.msra.mxu0 %v2928_v8  ;;  %v3024_v8 = vld [vmem:[#allocation6 + $0x1ac] ss:$16 sps:$4 sm:$0xff]  }
  0xb2   :  { %1815 = vmatpush1.bf16.msra.mxu1 %v2931_v9  ;;  %1775 = vmatprep.subr.bf16.mxu0 %v2936_v10  ;;  %v3027_v9 = vld [vmem:[#allocation6 + $0x3ac] ss:$16 sps:$4 sm:$0xff]   ;;  %v3022_v10 = vld [vmem:[#allocation6 + $0x1a8] ss:$16 sps:$4 sm:$0xff]  }
  0xb3   :  { %1816 = vmatprep.subr.bf16.mxu1 %v2939_v11  ;;  %v3025_v11 = vld [vmem:[#allocation6 + $0x3a8] ss:$16 sps:$4 sm:$0xff]  }
  0xb5   :  { %1776 = vmatpush1.bf16.msra.mxu0 %v2934_v12  ;;  %v3030_v12 = vld [vmem:[#allocation6 + $0x1cc] ss:$16 sps:$4 sm:$0xff]  }
  0xb6   :  { %1817 = vmatpush1.bf16.msra.mxu1 %v2937_v13  ;;  %1827 = vmatprep.subr.bf16.mxu0 %v2946_v14  ;;  %v3033_v13 = vld [vmem:[#allocation6 + $0x3cc] ss:$16 sps:$4 sm:$0xff]   ;;  %v3028_v14 = vld [vmem:[#allocation6 + $0x1c8] ss:$16 sps:$4 sm:$0xff]  }
  0xb7   :  { %1868 = vmatprep.subr.bf16.mxu1 %v2949_v15  ;;  %v3031_v15 = vld [vmem:[#allocation6 + $0x3c8] ss:$16 sps:$4 sm:$0xff]  }
  0xb8   :  { %1778 = vmatmul.mubr.bf16.vlgmr.msra.gmra.mrb[4].mxu0 %v3368_v16 }
  0xb9   :  { %1819 = vmatmul.mubr.bf16.vlgmr.msra.gmra.mrb[4].mxu1 %v3372_v17  ;;  %1828 = vmatpush1.bf16.msra.mxu0 %v2944_v18  ;;  %v3036_v18 = vld [vmem:[#allocation6 + $0x1ec] ss:$16 sps:$4 sm:$0xff]  }
  0xba   :  { %1869 = vmatpush1.bf16.msra.mxu1 %v2947_v19  ;;  %1829 = vmatprep.subr.bf16.mxu0 %v2952_v20  ;;  %v3039_v19 = vld [vmem:[#allocation6 + $0x3ec] ss:$16 sps:$4 sm:$0xff]   ;;  %v3034_v20 = vld [vmem:[#allocation6 + $0x1e8] ss:$16 sps:$4 sm:$0xff]  }
  0xbb   :  { %1870 = vmatprep.subr.bf16.mxu1 %v2955_v21  ;;  %1859 = vmatprep.mubr.bf16.mxu0 %v3340_v47  ;;  %v2971_v47 = vld [vmem:[#allocation6 + $0x288] ss:$16 sps:$4 sm:$0xff]  }
  0xbc   :  { %1900 = vmatprep.mubr.bf16.mxu1 %v3342_v51  ;;  %v2976_v51 = vld [vmem:[#allocation6 + $0xac] ss:$16 sps:$4 sm:$0xff]   ;;  %v3037_v21 = vld [vmem:[#allocation6 + $0x3e8] ss:$16 sps:$4 sm:$0xff]  }
  0xbd   :  { %1830 = vmatpush1.bf16.msra.mxu0 %v2950_v22  ;;  %v3042_v22 = vld [vmem:[#allocation6 + $0x40c] ss:$16 sps:$4 sm:$0xff]  }
  0xbe   :  { %1871 = vmatpush1.bf16.msra.mxu1 %v2953_v23  ;;  %1831 = vmatprep.subr.bf16.mxu0 %v2958_v24  ;;  %v3045_v23 = vld [vmem:[#allocation6 + $0x60c] ss:$16 sps:$4 sm:$0xff]   ;;  %v3040_v24 = vld [vmem:[#allocation6 + $0x408] ss:$16 sps:$4 sm:$0xff]  }
  0xbf   :  { %1872 = vmatprep.subr.bf16.mxu1 %v2961_v25  ;;  %v3043_v25 = vld [vmem:[#allocation6 + $0x608] ss:$16 sps:$4 sm:$0xff]  }
  0xc1   :  { %1832 = vmatpush1.bf16.msra.mxu0 %v2956_v26  ;;  %v3048_v26 = vld [vmem:[#allocation6 + $0x42c] ss:$16 sps:$4 sm:$0xff]  }
  0xc2   :  { %1873 = vmatpush1.bf16.msra.mxu1 %v2959_v27  ;;  %1833 = vmatprep.subr.bf16.mxu0 %v2964_v28  ;;  %v3051_v27 = vld [vmem:[#allocation6 + $0x62c] ss:$16 sps:$4 sm:$0xff]   ;;  %v3046_v28 = vld [vmem:[#allocation6 + $0x428] ss:$16 sps:$4 sm:$0xff]  }
  0xc3   :  { %1874 = vmatprep.subr.bf16.mxu1 %v2967_v29  ;;  %v3049_v29 = vld [vmem:[#allocation6 + $0x628] ss:$16 sps:$4 sm:$0xff]  }
  0xc5   :  { %1834 = vmatpush1.bf16.msra.mxu0 %v2962_v30  ;;  %v3054_v30 = vld [vmem:[#allocation6 + $0x44c] ss:$16 sps:$4 sm:$0xff]  }
  0xc6   :  { %1875 = vmatpush1.bf16.msra.mxu1 %v2965_v31  ;;  %1835 = vmatprep.subr.bf16.mxu0 %v2970_v32  ;;  %v3057_v31 = vld [vmem:[#allocation6 + $0x64c] ss:$16 sps:$4 sm:$0xff]   ;;  %v3052_v32 = vld [vmem:[#allocation6 + $0x448] ss:$16 sps:$4 sm:$0xff]  }
  0xc7   :  { %1876 = vmatprep.subr.bf16.mxu1 %v2973_v33  ;;  %v3055_v33 = vld [vmem:[#allocation6 + $0x648] ss:$16 sps:$4 sm:$0xff]  }
  0xc9   :  { %1836 = vmatpush1.bf16.msra.mxu0 %v2968_v34  ;;  %v3058_v34 = vld [vmem:[#allocation6 + $0x468] ss:$16 sps:$4 sm:$0xff]  }
  0xca   :  { %1877 = vmatpush1.bf16.msra.mxu1 %v2971_v47  ;;  %1837 = vmatprep.subr.bf16.mxu0 %v2976_v51  ;;  %v3061_v47 = vld [vmem:[#allocation6 + $0x668] ss:$16 sps:$4 sm:$0xff]   ;;  %v3066_v51 = vld [vmem:[#allocation6 + $0x48c] ss:$16 sps:$4 sm:$0xff]  }
  0xcb   :  { %1878 = vmatprep.subr.bf16.mxu1 %v2979_v35  ;;  %v3069_v35 = vld [vmem:[#allocation6 + $0x68c] ss:$16 sps:$4 sm:$0xff]  }
  0xcd   :  { %1838 = vmatpush1.bf16.msra.mxu0 %v2974_v38  ;;  %v3072_v38 = vld [vmem:[#allocation6 + $0x4ac] ss:$16 sps:$4 sm:$0xff]  }
  0xce   :  { %1879 = vmatpush1.bf16.msra.mxu1 %v2977_v39  ;;  %1839 = vmatprep.subr.bf16.mxu0 %v2982_v40  ;;  %v3075_v39 = vld [vmem:[#allocation6 + $0x6ac] ss:$16 sps:$4 sm:$0xff]   ;;  %v3070_v40 = vld [vmem:[#allocation6 + $0x4a8] ss:$16 sps:$4 sm:$0xff]  }
  0xcf   :  { %1880 = vmatprep.subr.bf16.mxu1 %v2985_v41  ;;  %v3073_v41 = vld [vmem:[#allocation6 + $0x6a8] ss:$16 sps:$4 sm:$0xff]  }
  0xd1   :  { %1840 = vmatpush1.bf16.msra.mxu0 %v2980_v42  ;;  %v3078_v42 = vld [vmem:[#allocation6 + $0x4cc] ss:$16 sps:$4 sm:$0xff]  }
  0xd2   :  { %1881 = vmatpush1.bf16.msra.mxu1 %v2983_v43  ;;  %1841 = vmatprep.subr.bf16.mxu0 %v2988_v44  ;;  %v3081_v43 = vld [vmem:[#allocation6 + $0x6cc] ss:$16 sps:$4 sm:$0xff]   ;;  %v3076_v44 = vld [vmem:[#allocation6 + $0x4c8] ss:$16 sps:$4 sm:$0xff]  }
  0xd3   :  { %1882 = vmatprep.subr.bf16.mxu1 %v2991_v45  ;;  %v3079_v45 = vld [vmem:[#allocation6 + $0x6c8] ss:$16 sps:$4 sm:$0xff]  }
  0xd5   :  { %1842 = vmatpush1.bf16.msra.mxu0 %v2986_v46  ;;  %v3084_v46 = vld [vmem:[#allocation6 + $0x4ec] ss:$16 sps:$4 sm:$0xff]  }
  0xd6   :  { %1883 = vmatpush1.bf16.msra.mxu1 %v2989_v48  ;;  %1843 = vmatprep.subr.bf16.mxu0 %v2994_v49  ;;  %v3087_v48 = vld [vmem:[#allocation6 + $0x6ec] ss:$16 sps:$4 sm:$0xff]   ;;  %v3082_v49 = vld [vmem:[#allocation6 + $0x4e8] ss:$16 sps:$4 sm:$0xff]  }
  0xd7   :  { %1884 = vmatprep.subr.bf16.mxu1 %v2997_v50  ;;  %v3085_v50 = vld [vmem:[#allocation6 + $0x6e8] ss:$16 sps:$4 sm:$0xff]  }
  0xd9   :  { %1844 = vmatpush1.bf16.msra.mxu0 %v2992_v52  ;;  %v3090_v52 = vld [vmem:[#allocation6 + $0x50c] ss:$16 sps:$4 sm:$0xff]  }
  0xda   :  { %1885 = vmatpush1.bf16.msra.mxu1 %v2995_v53  ;;  %1845 = vmatprep.subr.bf16.mxu0 %v3000_v54  ;;  %v3093_v53 = vld [vmem:[#allocation6 + $0x70c] ss:$16 sps:$4 sm:$0xff]   ;;  %v3088_v54 = vld [vmem:[#allocation6 + $0x508] ss:$16 sps:$4 sm:$0xff]  }
  0xdb   :  { %1886 = vmatprep.subr.bf16.mxu1 %v3003_v55  ;;  %v3091_v55 = vld [vmem:[#allocation6 + $0x708] ss:$16 sps:$4 sm:$0xff]  }
  0xdd   :  { %1846 = vmatpush1.bf16.msra.mxu0 %v2998_v56  ;;  %v3096_v56 = vld [vmem:[#allocation6 + $0x52c] ss:$16 sps:$4 sm:$0xff]  }
  0xde   :  { %1887 = vmatpush1.bf16.msra.mxu1 %v3001_v57  ;;  %1847 = vmatprep.subr.bf16.mxu0 %v3006_v58  ;;  %v3099_v57 = vld [vmem:[#allocation6 + $0x72c] ss:$16 sps:$4 sm:$0xff]   ;;  %v3094_v58 = vld [vmem:[#allocation6 + $0x528] ss:$16 sps:$4 sm:$0xff]  }
  0xdf   :  { %1888 = vmatprep.subr.bf16.mxu1 %v3009_v59  ;;  %v3097_v59 = vld [vmem:[#allocation6 + $0x728] ss:$16 sps:$4 sm:$0xff]  }
  0xe1   :  { %1848 = vmatpush1.bf16.msra.mxu0 %v3004_v60  ;;  %v3102_v60 = vld [vmem:[#allocation6 + $0x54c] ss:$16 sps:$4 sm:$0xff]  }
  0xe2   :  { %1889 = vmatpush1.bf16.msra.mxu1 %v3007_v61  ;;  %1849 = vmatprep.subr.bf16.mxu0 %v3012_v62  ;;  %v3105_v61 = vld [vmem:[#allocation6 + $0x74c] ss:$16 sps:$4 sm:$0xff]   ;;  %v3100_v62 = vld [vmem:[#allocation6 + $0x548] ss:$16 sps:$4 sm:$0xff]  }
  0xe3   :  { %1890 = vmatprep.subr.bf16.mxu1 %v3015_v63  ;;  %v3103_v63 = vld [vmem:[#allocation6 + $0x748] ss:$16 sps:$4 sm:$0xff]  }
  0xe5   :  { %1850 = vmatpush1.bf16.msra.mxu0 %v3010_v0  ;;  %v3108_v0 = vld [vmem:[#allocation6 + $0x56c] ss:$16 sps:$4 sm:$0xff]  }
  0xe6   :  { %1891 = vmatpush1.bf16.msra.mxu1 %v3013_v1  ;;  %1851 = vmatprep.subr.bf16.mxu0 %v3018_v2  ;;  %v3111_v1 = vld [vmem:[#allocation6 + $0x76c] ss:$16 sps:$4 sm:$0xff]   ;;  %v3106_v2 = vld [vmem:[#allocation6 + $0x568] ss:$16 sps:$4 sm:$0xff]  }
  0xe7   :  { %1892 = vmatprep.subr.bf16.mxu1 %v3021_v3  ;;  %v3109_v3 = vld [vmem:[#allocation6 + $0x768] ss:$16 sps:$4 sm:$0xff]  }
  0xe9   :  { %1852 = vmatpush1.bf16.msra.mxu0 %v3016_v4  ;;  %v3114_v4 = vld [vmem:[#allocation6 + $0x58c] ss:$16 sps:$4 sm:$0xff]  }
  0xea   :  { %1893 = vmatpush1.bf16.msra.mxu1 %v3019_v5  ;;  %1853 = vmatprep.subr.bf16.mxu0 %v3024_v8  ;;  %v3117_v5 = vld [vmem:[#allocation6 + $0x78c] ss:$16 sps:$4 sm:$0xff]   ;;  %v3112_v8 = vld [vmem:[#allocation6 + $0x588] ss:$16 sps:$4 sm:$0xff]  }
  0xeb   :  { %1894 = vmatprep.subr.bf16.mxu1 %v3027_v9  ;;  %v3115_v9 = vld [vmem:[#allocation6 + $0x788] ss:$16 sps:$4 sm:$0xff]  }
  0xed   :  { %1854 = vmatpush1.bf16.msra.mxu0 %v3022_v10  ;;  %v3120_v10 = vld [vmem:[#allocation6 + $0x5ac] ss:$16 sps:$4 sm:$0xff]  }
  0xee   :  { %1895 = vmatpush1.bf16.msra.mxu1 %v3025_v11  ;;  %1855 = vmatprep.subr.bf16.mxu0 %v3030_v12  ;;  %v3123_v11 = vld [vmem:[#allocation6 + $0x7ac] ss:$16 sps:$4 sm:$0xff]   ;;  %v3118_v12 = vld [vmem:[#allocation6 + $0x5a8] ss:$16 sps:$4 sm:$0xff]  }
  0xef   :  { %1896 = vmatprep.subr.bf16.mxu1 %v3033_v13  ;;  %v3121_v13 = vld [vmem:[#allocation6 + $0x7a8] ss:$16 sps:$4 sm:$0xff]  }
  0xf1   :  { %1856 = vmatpush1.bf16.msra.mxu0 %v3028_v14  ;;  %v3126_v14 = vld [vmem:[#allocation6 + $0x5cc] ss:$16 sps:$4 sm:$0xff]  }
  0xf2   :  { %1897 = vmatpush1.bf16.msra.mxu1 %v3031_v15  ;;  %1857 = vmatprep.subr.bf16.mxu0 %v3036_v18  ;;  %v3129_v15 = vld [vmem:[#allocation6 + $0x7cc] ss:$16 sps:$4 sm:$0xff]   ;;  %v3124_v18 = vld [vmem:[#allocation6 + $0x5c8] ss:$16 sps:$4 sm:$0xff]  }
  0xf3   :  { %1898 = vmatprep.subr.bf16.mxu1 %v3039_v19  ;;  %v3127_v19 = vld [vmem:[#allocation6 + $0x7c8] ss:$16 sps:$4 sm:$0xff]  }
  0xf5   :  { %1858 = vmatpush1.bf16.msra.mxu0 %v3034_v20  ;;  %v3132_v20 = vld [vmem:[#allocation6 + $0x5ec] ss:$16 sps:$4 sm:$0xff]  }
  0xf6   :  { %1899 = vmatpush1.bf16.msra.mxu1 %v3037_v21  ;;  %1909 = vmatprep.subr.bf16.mxu0 %v3042_v22  ;;  %v3135_v21 = vld [vmem:[#allocation6 + $0x7ec] ss:$16 sps:$4 sm:$0xff]   ;;  %v3130_v22 = vld [vmem:[#allocation6 + $0x5e8] ss:$16 sps:$4 sm:$0xff]  }
  0xf7   :  { %1950 = vmatprep.subr.bf16.mxu1 %v3045_v23  ;;  %v3133_v23 = vld [vmem:[#allocation6 + $0x7e8] ss:$16 sps:$4 sm:$0xff]  }
  0xf8   :  { %1860 = vmatmul.mubr.bf16.vlgmr.msra.gmra.mrb[8].mxu0 %v3346_v6  ;;  %v3060_v6 = vld [vmem:[#allocation6 + $0x46c] ss:$16 sps:$4 sm:$0xff]  }
  0xf9   :  { %1901 = vmatmul.mubr.bf16.vlgmr.msra.gmra.mrb[8].mxu1 %v3348_v7  ;;  %1910 = vmatpush1.bf16.msra.mxu0 %v3040_v24  ;;  %v3063_v7 = vld [vmem:[#allocation6 + $0x66c] ss:$16 sps:$4 sm:$0xff]  }
  0xfa   :  { %1951 = vmatpush1.bf16.msra.mxu1 %v3043_v25  ;;  %1911 = vmatprep.subr.bf16.mxu0 %v3048_v26 }
  0xfb   :  { %1952 = vmatprep.subr.bf16.mxu1 %v3051_v27  ;;  %1941 = vmatprep.mubr.bf16.mxu0 %v3358_v36  ;;  %v3064_v36 = vld [vmem:[#allocation6 + $0x488] ss:$16 sps:$4 sm:$0xff]  }
  0xfc   :  { %1982 = vmatprep.mubr.bf16.mxu1 %v3362_v37  ;;  %v3067_v37 = vld [vmem:[#allocation6 + $0x688] ss:$16 sps:$4 sm:$0xff]  }
  0xfd   :  { %1912 = vmatpush1.bf16.msra.mxu0 %v3046_v28 }
  0xfe   :  { %1953 = vmatpush1.bf16.msra.mxu1 %v3049_v29  ;;  %1913 = vmatprep.subr.bf16.mxu0 %v3054_v30 }
  0xff   :  { %1954 = vmatprep.subr.bf16.mxu1 %v3057_v31 }
 0x101   :  { %1914 = vmatpush1.bf16.msra.mxu0 %v3052_v32 }
 0x102   :  { %1955 = vmatpush1.bf16.msra.mxu1 %v3055_v33  ;;  %1915 = vmatprep.subr.bf16.mxu0 %v3060_v6 }
 0x103   :  { %1956 = vmatprep.subr.bf16.mxu1 %v3063_v7 }
 0x105   :  { %1916 = vmatpush1.bf16.msra.mxu0 %v3058_v34 }
 0x106   :  { %1957 = vmatpush1.bf16.msra.mxu1 %v3061_v47  ;;  %1917 = vmatprep.subr.bf16.mxu0 %v3066_v51 }
 0x107   :  { %1958 = vmatprep.subr.bf16.mxu1 %v3069_v35 }
 0x109   :  { %1918 = vmatpush1.bf16.msra.mxu0 %v3064_v36 }
 0x10a   :  { %1959 = vmatpush1.bf16.msra.mxu1 %v3067_v37  ;;  %1919 = vmatprep.subr.bf16.mxu0 %v3072_v38 }
 0x10b   :  { %1960 = vmatprep.subr.bf16.mxu1 %v3075_v39 }
 0x10d   :  { %1920 = vmatpush1.bf16.msra.mxu0 %v3070_v40  ;;  %v3136_v40 = vld [vmem:[#allocation8 + $0x40] sm:$0xff]  }
 0x10e   :  { %1961 = vmatpush1.bf16.msra.mxu1 %v3073_v41  ;;  %1921 = vmatprep.subr.bf16.mxu0 %v3078_v42  ;;  %v3137_v41 = vld [vmem:[#allocation8 + $0xc0] sm:$0xff]  }
 0x10f   :  { %1962 = vmatprep.subr.bf16.mxu1 %v3081_v43  ;;  %v3138_v42 = vld [vmem:[#allocation8] sm:$0xff]  }
 0x110   :  { %v3139_v43 = vld [vmem:[#allocation8 + $0x80] sm:$0xff]  }
 0x111   :  { %1922 = vmatpush1.bf16.msra.mxu0 %v3076_v44  ;;  %v3140_v44 = vld [vmem:[#allocation8 + $0x48] sm:$0xff]  }
 0x112   :  { %1963 = vmatpush1.bf16.msra.mxu1 %v3079_v45  ;;  %1923 = vmatprep.subr.bf16.mxu0 %v3084_v46  ;;  %v3141_v45 = vld [vmem:[#allocation8 + $0xc8] sm:$0xff]  }
 0x113   :  { %1964 = vmatprep.subr.bf16.mxu1 %v3087_v48  ;;  %v3142_v46 = vld [vmem:[#allocation8 + $0x8] sm:$0xff]  }
 0x114   :  { %v3143_v48 = vld [vmem:[#allocation8 + $0x88] sm:$0xff]  }
 0x115   :  { %1924 = vmatpush1.bf16.msra.mxu0 %v3082_v49  ;;  %v3144_v49 = vld [vmem:[#allocation8 + $0x50] sm:$0xff]  }
 0x116   :  { %1965 = vmatpush1.bf16.msra.mxu1 %v3085_v50  ;;  %1925 = vmatprep.subr.bf16.mxu0 %v3090_v52  ;;  %v3145_v50 = vld [vmem:[#allocation8 + $0xd0] sm:$0xff]  }
 0x117   :  { %1966 = vmatprep.subr.bf16.mxu1 %v3093_v53  ;;  %v3146_v52 = vld [vmem:[#allocation8 + $0x10] sm:$0xff]  }
 0x118   :  { %v3147_v53 = vld [vmem:[#allocation8 + $0x90] sm:$0xff]  }
 0x119   :  { %1926 = vmatpush1.bf16.msra.mxu0 %v3088_v54  ;;  %v3148_v54 = vld [vmem:[#allocation8 + $0x58] sm:$0xff]  }
 0x11a   :  { %1967 = vmatpush1.bf16.msra.mxu1 %v3091_v55  ;;  %1927 = vmatprep.subr.bf16.mxu0 %v3096_v56  ;;  %v3149_v55 = vld [vmem:[#allocation8 + $0xd8] sm:$0xff]  }
 0x11b   :  { %1968 = vmatprep.subr.bf16.mxu1 %v3099_v57  ;;  %v3150_v56 = vld [vmem:[#allocation8 + $0x18] sm:$0xff]  }
 0x11c   :  { %v3151_v57 = vld [vmem:[#allocation8 + $0x98] sm:$0xff]  }
 0x11d   :  { %1928 = vmatpush1.bf16.msra.mxu0 %v3094_v58 }
 0x11e   :  { %1969 = vmatpush1.bf16.msra.mxu1 %v3097_v59  ;;  %1929 = vmatprep.subr.bf16.mxu0 %v3102_v60 }
 0x11f   :  { %1970 = vmatprep.subr.bf16.mxu1 %v3105_v61 }
 0x121   :  { %1930 = vmatpush1.bf16.msra.mxu0 %v3100_v62 }
 0x122   :  { %1971 = vmatpush1.bf16.msra.mxu1 %v3103_v63  ;;  %1931 = vmatprep.subr.bf16.mxu0 %v3108_v0 }
 0x123   :  { %1972 = vmatprep.subr.bf16.mxu1 %v3111_v1 }
 0x125   :  { %1932 = vmatpush1.bf16.msra.mxu0 %v3106_v2 }
 0x126   :  { %1973 = vmatpush1.bf16.msra.mxu1 %v3109_v3  ;;  %1933 = vmatprep.subr.bf16.mxu0 %v3114_v4  ;;  %v67_v4 = vlaneseq }
 0x127   :  { %1974 = vmatprep.subr.bf16.mxu1 %v3117_v5 }
 0x128   :  { %v68_v5 = vshrl.u32 %v67_v4, 7 }
 0x129   :  { %1934 = vmatpush1.bf16.msra.mxu0 %v3112_v8 }
 0x12a   :  { %1975 = vmatpush1.bf16.msra.mxu1 %v3115_v9  ;;  %1935 = vmatprep.subr.bf16.mxu0 %v3120_v10  ;;  %v69_v8 = vsub.s32 0, %v68_v5  ;;  %v73_v9 = vsub.s32 1, %v68_v5  ;;  %v65_v10 = vld [vmem:[%s3409_s2] sm:$0xf] }
 0x12b   :  { %1976 = vmatprep.subr.bf16.mxu1 %v3123_v11 }
 0x12c   :  { %v70_v11 = vrot.slane %v65_v10, %v69_v8 }
 0x12d   :  { %1936 = vmatpush1.bf16.msra.mxu0 %v3118_v12  ;;  %v74_v12 = vrot.slane %v65_v10, %v73_v9  ;;  %v2659_v9 = vld [vmem:[%s3411_s4] ss:$0 sm:$0xff]  ;;  %s3238_s4 = scalar_lea.vmem %s2386_s9, 128 }
 0x12e   :  { %1977 = vmatpush1.bf16.msra.mxu1 %v3121_v13  ;;  %1937 = vmatprep.subr.bf16.mxu0 %v3126_v14  ;;  %p3239_p10 = scmp.ne.s32.totalorder %s2386_s9, %s3238_s4  ;;  %p3244_p12 = scmp.lt.s32.totalorder %s3238_s4, %s3238_s4 }
 0x12f   :  { %1978 = vmatprep.subr.bf16.mxu1 %v3129_v15  ;;  %v77_v15 = vsub.s32 2, %v68_v5 }
 0x130   :  { %p3245_p13 = por %p3244_p12, %p3243_p11 }
 0x131   :  { %1938 = vmatpush1.bf16.msra.mxu0 %v3124_v18  ;;  %v81_v18 = vsub.s32 3, %v68_v5 }
 0x132   :  { %1979 = vmatpush1.bf16.msra.mxu1 %v3127_v19  ;;  %1939 = vmatprep.subr.bf16.mxu0 %v3132_v20  ;;  %p3246_p0 = pnand %p3245_p13, %p3239_p10 }
 0x133   :  { %1980 = vmatprep.subr.bf16.mxu1 %v3135_v21 }
 0x135   :  { %1940 = vmatpush1.bf16.msra.mxu0 %v3130_v22 }
 0x136   :  { %1981 = vmatpush1.bf16.msra.mxu1 %v3133_v23  ;;  %2692 = vmatprep.subr.bf16.mxu0 %v3136_v40  ;;  %v3152_v40 = vld [vmem:[#allocation8 + $0x60] sm:$0xff]  }
 0x137   :  { %2714 = vmatprep.subr.bf16.mxu1 %v3137_v41  ;;  %v3153_v41 = vld [vmem:[#allocation8 + $0xe0] sm:$0xff]  }
 0x138   :  { %1942 = vmatmul.mubr.bf16.vlgmr.msra.gmra.mrb[12].mxu0 %v3368_v16 }
 0x139   :  { %1983 = vmatmul.mubr.bf16.vlgmr.msra.gmra.mrb[12].mxu1 %v3372_v17  ;;  %2693 = vmatpush3.bf16.msra.mxu0 %v3138_v42  ;;  %v3154_v42 = vld [vmem:[#allocation8 + $0x20] sm:$0xff]  }
 0x13a   :  { %2715 = vmatpush3.bf16.msra.mxu1 %v3139_v43  ;;  %2694 = vmatprep.subr.bf16.mxu0 %v3140_v44  ;;  %v3155_v43 = vld [vmem:[#allocation8 + $0xa0] sm:$0xff]   ;;  %v3156_v44 = vld [vmem:[#allocation8 + $0x68] sm:$0xff]  }
 0x13b   :  { %2716 = vmatprep.subr.bf16.mxu1 %v3141_v45  ;;  %v3157_v45 = vld [vmem:[#allocation8 + $0xe8] sm:$0xff]  }
 0x13d   :  { %2695 = vmatpush3.bf16.msra.mxu0 %v3142_v46  ;;  %v3158_v46 = vld [vmem:[#allocation8 + $0x28] sm:$0xff]  }
 0x13e   :  { %2717 = vmatpush3.bf16.msra.mxu1 %v3143_v48  ;;  %2696 = vmatprep.subr.bf16.mxu0 %v3144_v49  ;;  %v3159_v48 = vld [vmem:[#allocation8 + $0xa8] sm:$0xff]   ;;  %v3160_v49 = vld [vmem:[#allocation8 + $0x70] sm:$0xff]  }
 0x13f   :  { %2718 = vmatprep.subr.bf16.mxu1 %v3145_v50  ;;  %v3161_v50 = vld [vmem:[#allocation8 + $0xf0] sm:$0xff]  }
 0x141   :  { %2697 = vmatpush3.bf16.msra.mxu0 %v3146_v52  ;;  %v3162_v52 = vld [vmem:[#allocation8 + $0x30] sm:$0xff]  }
 0x142   :  { %2719 = vmatpush3.bf16.msra.mxu1 %v3147_v53  ;;  %2698 = vmatprep.subr.bf16.mxu0 %v3148_v54  ;;  %v3163_v53 = vld [vmem:[#allocation8 + $0xb0] sm:$0xff]   ;;  %v3164_v54 = vld [vmem:[#allocation8 + $0x78] sm:$0xff]  }
 0x143   :  { %2720 = vmatprep.subr.bf16.mxu1 %v3149_v55  ;;  %v3165_v55 = vld [vmem:[#allocation8 + $0xf8] sm:$0xff]  }
 0x145   :  { %2699 = vmatpush3.bf16.msra.mxu0 %v3150_v56  ;;  %v3166_v56 = vld [vmem:[#allocation8 + $0x38] sm:$0xff]  }
 0x146   :  { %2721 = vmatpush3.bf16.msra.mxu1 %v3151_v57  ;;  %2700 = vmatprep.subr.bf16.mxu0 %v3152_v40  ;;  %v3167_v57 = vld [vmem:[#allocation8 + $0xb8] sm:$0xff]  }
 0x147   :  { %2722 = vmatprep.subr.bf16.mxu1 %v3153_v41 }
 0x149   :  { %2701 = vmatpush3.bf16.msra.mxu0 %v3154_v42 }
 0x14a   :  { %2723 = vmatpush3.bf16.msra.mxu1 %v3155_v43  ;;  %2702 = vmatprep.subr.bf16.mxu0 %v3156_v44 }
 0x14b   :  { %v1697_v24 = vpop.f32.mrb[0].mxu0  ;;  %2724 = vmatprep.subr.bf16.mxu1 %v3157_v45 }
 0x14c   :  { %v1738_v25 = vpop.f32.mrb[0].mxu1  ;;  %v1699_v27 = vpop.f32.mrb[1].mxu0 }
 0x14d   :  { %v1739_v26 = vadd.f32 %v1738_v25, %v1697_v24  ;;  %v1740_v28 = vpop.f32.mrb[1].mxu1  ;;  %v1701_v30 = vpop.f32.mrb[2].mxu0  ;;  %v78_v24 = vrot.slane %v65_v10, %v77_v15  ;;  %2703 = vmatpush3.bf16.msra.mxu0 %v3158_v46 }
 0x14e   :  { %v1741_v29 = vadd.f32 %v1740_v28, %v1699_v27  ;;  %v1742_v31 = vpop.f32.mrb[2].mxu1  ;;  %v1702_v32 = vpop.f32.mrb[3].mxu0  ;;  %v82_v28 = vrot.slane %v65_v10, %v81_v18  ;;  %2725 = vmatpush3.bf16.msra.mxu1 %v3159_v48  ;;  %2704 = vmatprep.subr.bf16.mxu0 %v3160_v49 }
 0x14f   :  { %v1743_v33 = vpop.f32.mrb[3].mxu1  ;;  %2726 = vmatprep.subr.bf16.mxu1 %v3161_v50 }
 0x151   :  { %2705 = vmatpush3.bf16.msra.mxu0 %v3162_v52 }
 0x152   :  { %2727 = vmatpush3.bf16.msra.mxu1 %v3163_v53  ;;  %2706 = vmatprep.subr.bf16.mxu0 %v3164_v54 }
 0x153   :  { %2728 = vmatprep.subr.bf16.mxu1 %v3165_v55 }
 0x155   :  { %2707 = vmatpush3.bf16.msra.mxu0 %v3166_v56 }
 0x156   :  { %2729 = vmatpush3.bf16.msra.mxu1 %v3167_v57 }
 0x18b   :  { %v1779_v6 = vpop.f32.mrb[4].mxu0 }
 0x18c   :  { %v1820_v7 = vpop.f32.mrb[4].mxu1  ;;  %v1780_v34 = vadd.f32 %v1779_v6, %v1739_v26  ;;  %v1781_v47 = vpop.f32.mrb[5].mxu0 }
 0x18d   :  { %v1822_v51 = vpop.f32.mrb[5].mxu1  ;;  %v1782_v35 = vadd.f32 %v1781_v47, %v1741_v29  ;;  %v1783_v36 = vpop.f32.mrb[6].mxu0 }
 0x18e   :  { %v1824_v16 = vpop.f32.mrb[6].mxu1  ;;  %v1821_v37 = vadd.f32 %v1820_v7, %v1780_v34  ;;  %v1784_v17 = vpop.f32.mrb[7].mxu0 }
 0x18f   :  { %v1825_v38 = vpop.f32.mrb[7].mxu1  ;;  %v1823_v39 = vadd.f32 %v1822_v51, %v1782_v35 }
 0x190   :  { %v1991_v13 = vadd.f32 %v1821_v37, %v70_v11 }
 0x191   :  { %v1992_v14 = vadd.f32 %v1823_v39, %v74_v12 }
 0x192   :  { %v3387_v21 = vmax.f32 %v1991_v13, 0.0 }
 0x193   :  { %v2007_v22 = vmax.f32 %v1992_v14, 0.0 }
 0x194   :  { %v2010_v7 = vmul.f32 %v3387_v21, %v3387_v21 }
 0x195   :  { %v2011_v34 = vmul.f32 %v2007_v22, %v2007_v22 }
 0x197   :  { %v2014_v37 = vadd.f32 %v2011_v34, %v2010_v7 }
 0x1cb   :  { %v1861_v58 = vpop.f32.mrb[8].mxu0 }
 0x1cc   :  { %v1902_v59 = vpop.f32.mrb[8].mxu1  ;;  %v1863_v61 = vpop.f32.mrb[9].mxu0 }
 0x1cd   :  { %v1903_v60 = vadd.f32 %v1902_v59, %v1861_v58  ;;  %v1904_v62 = vpop.f32.mrb[9].mxu1  ;;  %v1865_v0 = vpop.f32.mrb[10].mxu0 }
 0x1ce   :  { %v1905_v63 = vadd.f32 %v1904_v62, %v1863_v61  ;;  %v1906_v1 = vpop.f32.mrb[10].mxu1  ;;  %v1866_v2 = vpop.f32.mrb[11].mxu0 }
 0x1cf   :  { %v1907_v3 = vpop.f32.mrb[11].mxu1 }
 0x20b   :  { %v1943_v19 = vpop.f32.mrb[12].mxu0 }
 0x20c   :  { %v1984_v20 = vpop.f32.mrb[12].mxu1  ;;  %v1944_v23 = vadd.f32 %v1943_v19, %v1903_v60  ;;  %v1945_v25 = vpop.f32.mrb[13].mxu0 }
 0x20d   :  { %v1986_v26 = vpop.f32.mrb[13].mxu1  ;;  %v1946_v27 = vadd.f32 %v1945_v25, %v1905_v63  ;;  %v1947_v29 = vpop.f32.mrb[14].mxu0 }
 0x20e   :  { %v1988_v30 = vpop.f32.mrb[14].mxu1  ;;  %v1985_v31 = vadd.f32 %v1984_v20, %v1944_v23  ;;  %v1948_v32 = vpop.f32.mrb[15].mxu0 }
 0x20f   :  { %v1989_v33 = vpop.f32.mrb[15].mxu1  ;;  %v1987_v6 = vadd.f32 %v1986_v26, %v1946_v27 }
 0x210   :  { %v1993_v47 = vadd.f32 %v1985_v31, %v78_v24 }
 0x211   :  { %v1994_v51 = vadd.f32 %v1987_v6, %v82_v28 }
 0x212   :  { %v2008_v35 = vmax.f32 %v1993_v47, 0.0 }
 0x213   :  { %v2009_v36 = vmax.f32 %v1994_v51, 0.0 }
 0x214   :  { %v2012_v16 = vmul.f32 %v2008_v35, %v2008_v35 }
 0x215   :  { %v2013_v17 = vmul.f32 %v2009_v36, %v2009_v36 }
 0x216   :  { %v2015_v38 = vadd.f32 %v2014_v37, %v2012_v16 }
 0x218   :  { %v2016_v39 = vadd.f32 %v2015_v38, %v2013_v17 }
 0x21a   :  { %2017 = vadd.xlane.f32.xlu0 %v2016_v39 }
 0x2a7   :  { %v2018_v58 = vpop.xlane.xlu0 %2017 }
 0x2a8   :  { %v2019_v59 = vmax.f32 %v2018_v58, 1e-24 }
 0x2aa   :  { %3168 = vrsqrt.f32 %v2019_v59 }
 0x2b4   :  { %v3169_v60 = vpop.eup %3168 }
 0x2b5   :  { %v2022_v61 = vmul.f32 %v3169_v60, %v2007_v22  ;;  %v2024_v62 = vmul.f32 %v3169_v60, %v2009_v36  ;;  %v2021_v63 = vmul.f32 %v3169_v60, %v3387_v21  ;;  %v2023_v0 = vmul.f32 %v3169_v60, %v2008_v35 }
 0x2b7   :  { %v2026_v1 = vpack.c.bf16 %v2022_v61, %v2022_v61  ;;  %v2028_v2 = vpack.c.bf16 %v2024_v62, %v2024_v62  ;;  %v2025_v3 = vpack.c.bf16 %v2021_v63, %v2021_v63  ;;  %v2027_v4 = vpack.c.bf16 %v2023_v0, %v2023_v0 }
 0x2b9   :  { %2324 = vmatprep.mubr.bf16.mxu0 %v2026_v1  ;;  %2364 = vmatprep.mubr.bf16.mxu1 %v2028_v2 }
 0x2ba   :  { %2325 = vmatmul.mubr.bf16.vlgmr.msra.gmra.mrb[16].mxu0 %v2025_v3  ;;  %2365 = vmatmul.mubr.bf16.vlgmr.msra.gmra.mrb[16].mxu1 %v2027_v4 }
 0x38d   :  { %v2708_v5 = vpop.f32.mrb[16].mxu0  ;;  %v2730_v8 = vpop.f32.mrb[16].mxu1 }
 0x38e   :  { %v2709_v10 = vpop.f32.mrb[17].mxu0  ;;  %v2731_v11 = vpop.f32.mrb[17].mxu1 }
 0x38f   :  { %v2710_v12 = vadd.f32 %v2709_v10, %v2708_v5  ;;  %v2732_v13 = vadd.f32 %v2731_v11, %v2730_v8  ;;  %v2711_v14 = vpop.f32.mrb[18].mxu0  ;;  %v2733_v15 = vpop.f32.mrb[18].mxu1 }
 0x390   :  { %v2712_v18 = vpop.f32.mrb[19].mxu0  ;;  %v2734_v19 = vpop.f32.mrb[19].mxu1 }
 0x391   :  { %v2327_v20 = vadd.f32 %v2710_v12, %v2659_v9 }
 0x393   :  { %v2367_v21 = vadd.f32 %v2732_v13, %v2327_v20 }
 0x395   :  { %v2372_v22 = vmul.f32 %v2367_v21, %v2367_v21 }
 0x397   :  { %2373 = vadd.xlane.f32.xlu0 %v2372_v22 }
 0x424   :  { %v2374_v23 = vpop.xlane.xlu0 %2373 }
 0x425   :  { %v2375_v24 = vmax.f32 %v2374_v23, 1e-24 }
 0x427   :  { %3170 = vrsqrt.f32 %v2375_v24 }
 0x431   :  { %v3171_v25 = vpop.eup %3170 }
 0x432   :  { %v2377_v26 = vmul.f32 %v3171_v25, %v2367_v21 }
 0x434   :  { %2378 = vst [vmem:[#allocation9] sm:$0xff] %v2377_v26 }
 0x435   :  { %3249 = shalt.err (!%p3246_p0)
}
 0x436   :  { %s3250_s12 = scalar_lea.hbm %s3412_s5, 128 }
 0x437   :  { %p3251_p1 = scmp.ne.s32.totalorder %s3412_s5, %s3250_s12  ;;  %p3254_p2 = scmp.lt.u32.totalorder %s3250_s12, %s3412_s5 }
 0x439   :  { %p3256_p3 = pnand %p3254_p2, %p3251_p1 }
 0x43b   :  { %3259 = shalt.err (!%p3256_p3)
}
 0x43c   :  { %2388 = dma.vmem_to_hbm [thread:$0]  %s2386_s9, 128, %s3412_s5, [#allocation5]  }
 0x43d   :  { %3264 = dma.done.wait [#allocation5], 128  }
 0x43e   :  { %3265 = vsyncadd [#allocation5], 4294967168 }
 0x43f   :  { %2392 = vsyncpa [#allocation4], 1 }
 0x440   :  { %2393 = vsyncpa [#allocation7], 1 }
 0x441   :  { %2394 = vsyncpa [#allocation5], 1 }

</bundles_post_ra>
